<compile_context>
chip_gen: v6e
topology: v6e:2x2x1
jax: 0.10.0
libtpu: 0.0.40
codegen_flags: <defaults>
</compile_context>

<pallas_src>
import functools

import jax
import jax.numpy as jnp
from jax.experimental import pallas as pl
from jax.experimental.pallas import tpu as pltpu


# ------------------------------------------------------------------
# Pallas kernels
# ------------------------------------------------------------------

def _dense_kernel(x_ref, w_ref, b_ref, o_ref):
    # x: [M, K], w: [K, N], b: [1, N]
    o_ref[...] = (
        jnp.dot(x_ref[...], w_ref[...], preferred_element_type=jnp.float32)
        + b_ref[...]
    )


def dense(x, w, b2):
    """x: [M, K], w: [K, N], b2: [1, N] -> [M, N] (MXU matmul + bias)."""
    M, K = x.shape
    K2, N = w.shape
    assert K == K2
    return pl.pallas_call(
        _dense_kernel,
        out_shape=jax.ShapeDtypeStruct((M, N), jnp.float32),
        grid=(1,),
        in_specs=[
            pl.BlockSpec((M, K), lambda i: (0, 0)),
            pl.BlockSpec((K, N), lambda i: (0, 0)),
            pl.BlockSpec((1, N), lambda i: (0, 0)),
        ],
        out_specs=pl.BlockSpec((M, N), lambda i: (0, 0)),
    )(x, w, b2)


def _layer_kernel(heads, dim_head, scale,
                  x_ref, g_ref, b_ref, wqkv_ref, bqkv_ref, wo_ref, bo_ref,
                  o_ref, a_ref):
    """Fused: PreNorm(LayerNorm) -> QKV -> MHA -> out proj -> +residual.

    Shapes (per grid step = one batch element):
      x_ref:    (1, N, D)        g_ref/b_ref:  (1, D)
      wqkv_ref: (D, 3*H*dh)      bqkv_ref:     (1, 3*H*dh)
      wo_ref:   (H*dh, D)        bo_ref:       (1, D)
      o_ref:    (1, N, D)        a_ref:        (1, H, N, N)
    """
    x = x_ref[0]                                     # (N, D)

    # LayerNorm (PyTorch semantics: biased variance, eps=1e-5).
    mean = jnp.mean(x, axis=-1, keepdims=True)
    var = jnp.mean(jnp.square(x - mean), axis=-1, keepdims=True)
    xn = (x - mean) * jax.lax.rsqrt(var + 1e-5)
    xn = xn * g_ref[...] + b_ref[...]                # (N, D)

    # Fused QKV projection: single MXU matmul, lane-dense 3*inner output.
    qkv = (jnp.dot(xn, wqkv_ref[...], preferred_element_type=jnp.float32)
           + bqkv_ref[...])                          # (N, 3*inner)
    inner = heads * dim_head
    q = qkv[:, :inner] * scale                       # pre-scale q (cheaper than scaling s)
    k = qkv[:, inner:2 * inner]
    v = qkv[:, 2 * inner:]
    wo = wo_ref[...]                                 # (inner, D)

    # Output projection accumulated per head + bias + residual.
    acc = bo_ref[...] + x                            # (N, D) via broadcast

    for h in range(heads):                           # static unroll, small H
        sl = slice(h * dim_head, (h + 1) * dim_head)
        qh = q[:, sl]                                # (N, dh)
        kh = k[:, sl]
        vh = v[:, sl]
        s = jnp.dot(qh, kh.T, preferred_element_type=jnp.float32)   # (N, N)
        s = s - jnp.max(s, axis=-1, keepdims=True)                  # stable softmax
        p = jnp.exp(s)
        p = p * pl.reciprocal(jnp.sum(p, axis=-1, keepdims=True), approx=True)
        a_ref[0, h] = p                                              # attn weights out
        oh = jnp.dot(p, vh, preferred_element_type=jnp.float32)      # (N, dh)
        acc = acc + jnp.dot(oh, wo[sl, :], preferred_element_type=jnp.float32)

    o_ref[0] = acc


def fused_attention_layer(x, ln_g, ln_b, wqkv, bqkv, wo, bo, *, heads, dim_head):
    """x: [B, N, D] -> (x + MHA(LN(x)) [B, N, D], attn [B, H, N, N])."""
    B, N, D = x.shape
    inner = heads * dim_head
    scale = float(dim_head) ** -0.5                  # Python float: baked constant
    kernel = functools.partial(_layer_kernel, heads, dim_head, scale)
    return pl.pallas_call(
        kernel,
        out_shape=(
            jax.ShapeDtypeStruct((B, N, D), jnp.float32),
            jax.ShapeDtypeStruct((B, heads, N, N), jnp.float32),
        ),
        grid=(B,),
        in_specs=[
            pl.BlockSpec((1, N, D), lambda i: (i, 0, 0)),
            pl.BlockSpec((1, D), lambda i: (0, 0)),
            pl.BlockSpec((1, D), lambda i: (0, 0)),
            pl.BlockSpec((D, 3 * inner), lambda i: (0, 0)),
            pl.BlockSpec((1, 3 * inner), lambda i: (0, 0)),
            pl.BlockSpec((inner, D), lambda i: (0, 0)),
            pl.BlockSpec((1, D), lambda i: (0, 0)),
        ],
        out_specs=(
            pl.BlockSpec((1, N, D), lambda i: (i, 0, 0)),
            pl.BlockSpec((1, heads, N, N), lambda i: (i, 0, 0, 0)),
        ),
        compiler_params=pltpu.CompilerParams(
            dimension_semantics=("parallel",)
        ),
    )(x, ln_g, ln_b, wqkv, bqkv, wo, bo)


def _head_kernel(x_ref, g_ref, b_ref, w_ref, hb_ref, o_ref):
    # Fused mlp_head: LayerNorm + Linear on the pooled [B, D] features.
    x = x_ref[...]                                   # (B, D)
    mean = jnp.mean(x, axis=-1, keepdims=True)
    var = jnp.mean(jnp.square(x - mean), axis=-1, keepdims=True)
    xn = (x - mean) * jax.lax.rsqrt(var + 1e-5)
    xn = xn * g_ref[...] + b_ref[...]
    o_ref[...] = (jnp.dot(xn, w_ref[...], preferred_element_type=jnp.float32)
                  + hb_ref[...])


def mlp_head(pooled, g, b, w, hb):
    """pooled: [B, D] -> logits [B, num_classes] (LayerNorm + Linear fused)."""
    B, D = pooled.shape
    num_classes = w.shape[1]
    return pl.pallas_call(
        _head_kernel,
        out_shape=jax.ShapeDtypeStruct((B, num_classes), jnp.float32),
        grid=(1,),
        in_specs=[
            pl.BlockSpec((B, D), lambda i: (0, 0)),
            pl.BlockSpec((1, D), lambda i: (0, 0)),
            pl.BlockSpec((1, D), lambda i: (0, 0)),
            pl.BlockSpec((D, num_classes), lambda i: (0, 0)),
            pl.BlockSpec((1, num_classes), lambda i: (0, 0)),
        ],
        out_specs=pl.BlockSpec((B, num_classes), lambda i: (0, 0)),
    )(pooled, g, b, w, hb)


# ------------------------------------------------------------------
# Model (parameter init + forward glue)
# ------------------------------------------------------------------

def init_params(key, *, image_size, patch_size, channels, dim, depth,
                heads, dim_head, num_classes):
    h = image_size // patch_size
    num_patches = h * h
    patch_dim = channels * patch_size * patch_size
    inner = heads * dim_head

    keys = jax.random.split(key, 4 + depth)
    kit = iter(keys)

    def w(k, shape, std=0.02):
        return (std * jax.random.normal(k, shape)).astype(jnp.float32)

    params = {
        "patch_w": w(next(kit), (patch_dim, dim)),
        "patch_b": jnp.zeros((1, dim), jnp.float32),
        "pos_embedding": jax.random.normal(
            next(kit), (1, num_patches + 1, dim), dtype=jnp.float32),
        "cls_token": jax.random.normal(
            next(kit), (1, 1, dim), dtype=jnp.float32),
        "head_ln_g": jnp.ones((1, dim), jnp.float32),
        "head_ln_b": jnp.zeros((1, dim), jnp.float32),
        "head_w": w(next(kit), (dim, num_classes)),
        "head_b": jnp.zeros((1, num_classes), jnp.float32),
        "layers": [],
    }
    for _ in range(depth):
        lk = jax.random.split(next(kit), 4)
        wq = w(lk[0], (dim, inner))
        wk = w(lk[1], (dim, inner))
        wv = w(lk[2], (dim, inner))
        params["layers"].append({
            "ln_g": jnp.ones((1, dim), jnp.float32),
            "ln_b": jnp.zeros((1, dim), jnp.float32),
            "wqkv": jnp.concatenate([wq, wk, wv], axis=1),   # [D, 3*inner]
            "bqkv": jnp.zeros((1, 3 * inner), jnp.float32),
            "wo": w(lk[3], (inner, dim)),
            "bo": jnp.zeros((1, dim), jnp.float32),
        })
    return params


def vit_forward(params, img, *, patch_size, heads, dim_head, pool="cls"):
    B, C, H, W = img.shape
    p = patch_size
    h, w_ = H // p, W // p
    dim = params["patch_w"].shape[1]

    # Rearrange 'b c (h p1) (w p2) -> b (h w) (p1 p2 c)' (layout plumbing in XLA).
    x = img.reshape(B, C, h, p, w_, p)
    x = jnp.transpose(x, (0, 2, 4, 3, 5, 1))          # b h w p1 p2 c
    x = x.reshape(B, h * w_, p * p * C)

    n = x.shape[1]
    # Patch embedding (Pallas matmul + bias).
    x = dense(x.reshape(B * n, -1), params["patch_w"],
              params["patch_b"]).reshape(B, n, dim)

    # cls token + positional embedding.
    cls_tokens = jnp.broadcast_to(params["cls_token"], (B, 1, dim))
    x = jnp.concatenate([cls_tokens, x], axis=1)       # [B, n+1, dim]
    x = x + params["pos_embedding"][:, : n + 1]

    attn_weights = []
    for layer in params["layers"]:
        # One fused Pallas kernel: LN -> QKV -> MHA -> out proj -> residual.
        x, attn_mat = fused_attention_layer(
            x, layer["ln_g"], layer["ln_b"], layer["wqkv"], layer["bqkv"],
            layer["wo"], layer["bo"], heads=heads, dim_head=dim_head)
        attn_weights.append(attn_mat)

    # Pooling.
    pooled = jnp.mean(x, axis=1) if pool == "mean" else x[:, 0]

    # mlp_head = LayerNorm + Linear (one tiny fused Pallas call).
    logits = mlp_head(pooled, params["head_ln_g"], params["head_ln_b"],
                      params["head_w"], params["head_b"])
    return logits, attn_weights


# ------------------------------------------------------------------
# Main
# ------------------------------------------------------------------

if __name__ == "__main__":
    # Small ViT config consistent with the module's constructor.
    IMAGE_SIZE = 16
    PATCH_SIZE = 4
    CHANNELS = 4
    DIM = 32
    DEPTH = 2
    HEADS = 4
    DIM_HEAD = 8
    NUM_CLASSES = 10
    BATCH = 2

    key = jax.random.PRNGKey(0)
    pkey, xkey = jax.random.split(key)

    params = init_params(
        pkey,
        image_size=IMAGE_SIZE, patch_size=PATCH_SIZE, channels=CHANNELS,
        dim=DIM, depth=DEPTH, heads=HEADS, dim_head=DIM_HEAD,
        num_classes=NUM_CLASSES,
    )
    img = jax.random.normal(
        xkey, (BATCH, CHANNELS, IMAGE_SIZE, IMAGE_SIZE), dtype=jnp.float32)

    forward = jax.jit(functools.partial(
        vit_forward, patch_size=PATCH_SIZE, heads=HEADS,
        dim_head=DIM_HEAD, pool="cls"))

    logits, attn_weights = forward(params, img)

    jax.block_until_ready(logits)
    for a in attn_weights:
        jax.block_until_ready(a)

    n_tokens = (IMAGE_SIZE // PATCH_SIZE) ** 2 + 1
    assert logits.shape == (BATCH, NUM_CLASSES)
    assert all(a.shape == (BATCH, HEADS, n_tokens, n_tokens)
               for a in attn_weights)
    assert bool(jnp.all(jnp.isfinite(logits)))

    print("KERNEL_OK")
</pallas_src>

<mosaic_0001>
module attributes {stable_mosaic.version = 11 : i64} {
  func.func @_dense_kernel(%arg0: i32, %arg1: memref<32x64xf32, #tpu.memory_space<vmem>>, %arg2: memref<64x32xf32, #tpu.memory_space<vmem>>, %arg3: memref<1x32xf32, #tpu.memory_space<vmem>>, %arg4: memref<32x32xf32, #tpu.memory_space<vmem>>) attributes {dimension_semantics = [#tpu.dimension_semantics<arbitrary>], iteration_bounds = array<i64: 1>, scalar_prefetch = 0 : i64, scratch_operands = 0 : i64, tpu.core_type = #tpu.core_type<tc>, window_params = [{pipeline_mode = #tpu.pipeline_mode<synchronous>, transform_indices = @transform_0, window_bounds = array<i64: 32, 64>}, {pipeline_mode = #tpu.pipeline_mode<synchronous>, transform_indices = @transform_1, window_bounds = array<i64: 64, 32>}, {pipeline_mode = #tpu.pipeline_mode<synchronous>, transform_indices = @transform_2, window_bounds = array<i64: 1, 32>}, {pipeline_mode = #tpu.pipeline_mode<synchronous>, transform_indices = @transform_3, window_bounds = array<i64: 32, 32>}]} {
    %c0 = arith.constant 0 : index
    %c0_0 = arith.constant 0 : index
    %0 = vector.load %arg1[%c0, %c0_0] : memref<32x64xf32, #tpu.memory_space<vmem>>, vector<32x64xf32>
    %c0_1 = arith.constant 0 : index
    %c0_2 = arith.constant 0 : index
    %1 = vector.load %arg2[%c0_1, %c0_2] : memref<64x32xf32, #tpu.memory_space<vmem>>, vector<64x32xf32>
    %cst = arith.constant dense<0.000000e+00> : vector<32x32xf32>
    %2 = tpu.matmul %0, %1, %cst {dimension_numbers = #tpu.dot_dimension_numbers<[1], [0], [0], [1], [0, 0, 1, 1], [], []>} : vector<32x64xf32>, vector<64x32xf32>, vector<32x32xf32> -> vector<32x32xf32>
    %c0_3 = arith.constant 0 : index
    %c0_4 = arith.constant 0 : index
    %3 = vector.load %arg3[%c0_3, %c0_4] : memref<1x32xf32, #tpu.memory_space<vmem>>, vector<1x32xf32>
    %4 = vector.broadcast %3 : vector<1x32xf32> to vector<32x32xf32>
    %5 = arith.addf %2, %4 : vector<32x32xf32>
    %c0_5 = arith.constant 0 : index
    %c0_6 = arith.constant 0 : index
    %6 = vector.load %arg4[%c0_5, %c0_6] : memref<32x32xf32, #tpu.memory_space<vmem>>, vector<32x32xf32>
    tpu.vector_store %arg4[%c0_5, %c0_6], %5 {strides = array<i32>} : memref<32x32xf32, #tpu.memory_space<vmem>>, vector<32x32xf32>,
    return
  }
  func.func @transform_0(%arg0: i32) -> (i32, i32) {
    %c0_i32 = arith.constant 0 : i32
    %c0_i32_0 = arith.constant 0 : i32
    %c0_i32_1 = arith.constant 0 : i32
    return %c0_i32, %c0_i32_0 : i32, i32
  }
  func.func @transform_1(%arg0: i32) -> (i32, i32) {
    %c0_i32 = arith.constant 0 : i32
    %c0_i32_0 = arith.constant 0 : i32
    %c0_i32_1 = arith.constant 0 : i32
    return %c0_i32, %c0_i32_0 : i32, i32
  }
  func.func @transform_2(%arg0: i32) -> (i32, i32) {
    %c0_i32 = arith.constant 0 : i32
    %c0_i32_0 = arith.constant 0 : i32
    %c0_i32_1 = arith.constant 0 : i32
    return %c0_i32, %c0_i32_0 : i32, i32
  }
  func.func @transform_3(%arg0: i32) -> (i32, i32) {
    %c0_i32 = arith.constant 0 : i32
    %c0_i32_0 = arith.constant 0 : i32
    %c0_i32_1 = arith.constant 0 : i32
    return %c0_i32, %c0_i32_0 : i32, i32
  }
}

module attributes {stable_mosaic.version = 11 : i64} {
  func.func @_layer_kernel(%arg0: i32, %arg1: memref<1x17x32xf32, #tpu.memory_space<vmem>>, %arg2: memref<1x32xf32, #tpu.memory_space<vmem>>, %arg3: memref<1x32xf32, #tpu.memory_space<vmem>>, %arg4: memref<32x96xf32, #tpu.memory_space<vmem>>, %arg5: memref<1x96xf32, #tpu.memory_space<vmem>>, %arg6: memref<32x32xf32, #tpu.memory_space<vmem>>, %arg7: memref<1x32xf32, #tpu.memory_space<vmem>>, %arg8: memref<1x17x32xf32, #tpu.memory_space<vmem>>, %arg9: memref<1x4x17x17xf32, #tpu.memory_space<vmem>>) attributes {dimension_semantics = [#tpu.dimension_semantics<parallel>], iteration_bounds = array<i64: 2>, scalar_prefetch = 0 : i64, scratch_operands = 0 : i64, tpu.core_type = #tpu.core_type<tc>, window_params = [{transform_indices = @transform_0, window_bounds = array<i64: 1, 17, 32>}, {pipeline_mode = #tpu.pipeline_mode<synchronous>, transform_indices = @transform_1, window_bounds = array<i64: 1, 32>}, {pipeline_mode = #tpu.pipeline_mode<synchronous>, transform_indices = @transform_2, window_bounds = array<i64: 1, 32>}, {pipeline_mode = #tpu.pipeline_mode<synchronous>, transform_indices = @transform_3, window_bounds = array<i64: 32, 96>}, {pipeline_mode = #tpu.pipeline_mode<synchronous>, transform_indices = @transform_4, window_bounds = array<i64: 1, 96>}, {pipeline_mode = #tpu.pipeline_mode<synchronous>, transform_indices = @transform_5, window_bounds = array<i64: 32, 32>}, {pipeline_mode = #tpu.pipeline_mode<synchronous>, transform_indices = @transform_6, window_bounds = array<i64: 1, 32>}, {transform_indices = @transform_7, window_bounds = array<i64: 1, 17, 32>}, {transform_indices = @transform_8, window_bounds = array<i64: 1, 4, 17, 17>}]} {
    %c0 = arith.constant 0 : index
    %c0_0 = arith.constant 0 : index
    %c0_1 = arith.constant 0 : index
    %0 = vector.load %arg1[%c0, %c0_0, %c0_1] : memref<1x17x32xf32, #tpu.memory_space<vmem>>, vector<1x17x32xf32>
    %1 = vector.shape_cast %0 : vector<1x17x32xf32> to vector<17x32xf32>
    %cst = arith.constant dense<0.000000e+00> : vector<17xf32>
    %2 = vector.multi_reduction <add>, %1, %cst [1] : vector<17x32xf32> to vector<17xf32>
    %3 = vector.shape_cast %2 : vector<17xf32> to vector<17x1xf32>
    %cst_2 = arith.constant 3.200000e+01 : f32
    %4 = vector.broadcast %cst_2 : f32 to vector<17x1xf32>
    %5 = arith.divf %3, %4 : vector<17x1xf32>
    %6 = vector.broadcast %5 : vector<17x1xf32> to vector<17x32xf32>
    %7 = arith.subf %1, %6 : vector<17x32xf32>
    %8 = arith.mulf %7, %7 : vector<17x32xf32>
    %cst_3 = arith.constant dense<0.000000e+00> : vector<17xf32>
    %9 = vector.multi_reduction <add>, %8, %cst_3 [1] : vector<17x32xf32> to vector<17xf32>
    %10 = vector.shape_cast %9 : vector<17xf32> to vector<17x1xf32>
    %cst_4 = arith.constant 3.200000e+01 : f32
    %11 = vector.broadcast %cst_4 : f32 to vector<17x1xf32>
    %12 = arith.divf %10, %11 : vector<17x1xf32>
    %13 = vector.broadcast %5 : vector<17x1xf32> to vector<17x32xf32>
    %14 = arith.subf %1, %13 : vector<17x32xf32>
    %cst_5 = arith.constant 9.99999974E-6 : f32
    %15 = vector.broadcast %cst_5 : f32 to vector<17x1xf32>
    %16 = arith.addf %12, %15 : vector<17x1xf32>
    %17 = math.rsqrt %16 : vector<17x1xf32>
    %18 = vector.broadcast %17 : vector<17x1xf32> to vector<17x32xf32>
    %19 = arith.mulf %14, %18 : vector<17x32xf32>
    %c0_6 = arith.constant 0 : index
    %c0_7 = arith.constant 0 : index
    %20 = vector.load %arg2[%c0_6, %c0_7] : memref<1x32xf32, #tpu.memory_space<vmem>>, vector<1x32xf32>
    %21 = vector.broadcast %20 : vector<1x32xf32> to vector<17x32xf32>
    %22 = arith.mulf %19, %21 : vector<17x32xf32>
    %c0_8 = arith.constant 0 : index
    %c0_9 = arith.constant 0 : index
    %23 = vector.load %arg3[%c0_8, %c0_9] : memref<1x32xf32, #tpu.memory_space<vmem>>, vector<1x32xf32>
    %24 = vector.broadcast %23 : vector<1x32xf32> to vector<17x32xf32>
    %25 = arith.addf %22, %24 : vector<17x32xf32>
    %c0_10 = arith.constant 0 : index
    %c0_11 = arith.constant 0 : index
    %26 = vector.load %arg4[%c0_10, %c0_11] : memref<32x96xf32, #tpu.memory_space<vmem>>, vector<32x96xf32>
    %cst_12 = arith.constant dense<0.000000e+00> : vector<17x96xf32>
    %27 = tpu.matmul %25, %26, %cst_12 {dimension_numbers = #tpu.dot_dimension_numbers<[1], [0], [0], [1], [0, 0, 1, 1], [], []>} : vector<17x32xf32>, vector<32x96xf32>, vector<17x96xf32> -> vector<17x96xf32>
    %c0_13 = arith.constant 0 : index
    %c0_14 = arith.constant 0 : index
    %28 = vector.load %arg5[%c0_13, %c0_14] : memref<1x96xf32, #tpu.memory_space<vmem>>, vector<1x96xf32>
    %29 = vector.broadcast %28 : vector<1x96xf32> to vector<17x96xf32>
    %30 = arith.addf %27, %29 : vector<17x96xf32>
    %31 = vector.extract_strided_slice %30 {offsets = [0, 0], sizes = [17, 32], strides = [1, 1]} : vector<17x96xf32> to vector<17x32xf32>
    %cst_15 = arith.constant 0.353553385 : f32
    %32 = vector.broadcast %cst_15 : f32 to vector<17x32xf32>
    %33 = arith.mulf %31, %32 : vector<17x32xf32>
    %34 = vector.extract_strided_slice %30 {offsets = [0, 32], sizes = [17, 32], strides = [1, 1]} : vector<17x96xf32> to vector<17x32xf32>
    %35 = vector.extract_strided_slice %30 {offsets = [0, 64], sizes = [17, 32], strides = [1, 1]} : vector<17x96xf32> to vector<17x32xf32>
    %c0_16 = arith.constant 0 : index
    %c0_17 = arith.constant 0 : index
    %36 = vector.load %arg6[%c0_16, %c0_17] : memref<32x32xf32, #tpu.memory_space<vmem>>, vector<32x32xf32>
    %c0_18 = arith.constant 0 : index
    %c0_19 = arith.constant 0 : index
    %37 = vector.load %arg7[%c0_18, %c0_19] : memref<1x32xf32, #tpu.memory_space<vmem>>, vector<1x32xf32>
    %38 = vector.broadcast %37 : vector<1x32xf32> to vector<17x32xf32>
    %39 = arith.addf %38, %1 : vector<17x32xf32>
    %40 = vector.extract_strided_slice %33 {offsets = [0, 0], sizes = [17, 8], strides = [1, 1]} : vector<17x32xf32> to vector<17x8xf32>
    %41 = vector.extract_strided_slice %34 {offsets = [0, 0], sizes = [17, 8], strides = [1, 1]} : vector<17x32xf32> to vector<17x8xf32>
    %42 = vector.extract_strided_slice %35 {offsets = [0, 0], sizes = [17, 8], strides = [1, 1]} : vector<17x32xf32> to vector<17x8xf32>
    %43 = tpu.transpose %41, [1, 0] : vector<17x8xf32> -> vector<8x17xf32>
    %cst_20 = arith.constant dense<0.000000e+00> : vector<17x17xf32>
    %44 = tpu.matmul %40, %43, %cst_20 {dimension_numbers = #tpu.dot_dimension_numbers<[1], [0], [0], [1], [0, 0, 1, 1], [], []>} : vector<17x8xf32>, vector<8x17xf32>, vector<17x17xf32> -> vector<17x17xf32>
    %cst_21 = arith.constant dense<0xFF800000> : vector<17xf32>
    %45 = vector.multi_reduction <maximumf>, %44, %cst_21 [1] : vector<17x17xf32> to vector<17xf32>
    %46 = vector.shape_cast %45 : vector<17xf32> to vector<17x1xf32>
    %47 = vector.broadcast %46 : vector<17x1xf32> to vector<17x17xf32>
    %48 = arith.subf %44, %47 : vector<17x17xf32>
    %49 = math.exp %48 : vector<17x17xf32>
    %cst_22 = arith.constant dense<0.000000e+00> : vector<17xf32>
    %50 = vector.multi_reduction <add>, %49, %cst_22 [1] : vector<17x17xf32> to vector<17xf32>
    %51 = vector.shape_cast %50 : vector<17xf32> to vector<17x1xf32>
    %52 = tpu.reciprocal %51 {approx = true} : vector<17x1xf32> -> vector<17x1xf32>
    %53 = vector.broadcast %52 : vector<17x1xf32> to vector<17x17xf32>
    %54 = arith.mulf %49, %53 : vector<17x17xf32>
    %c0_23 = arith.constant 0 : index
    %c0_24 = arith.constant 0 : index
    %c0_25 = arith.constant 0 : index
    %c0_26 = arith.constant 0 : index
    %55 = vector.load %arg9[%c0_23, %c0_24, %c0_25, %c0_26] : memref<1x4x17x17xf32, #tpu.memory_space<vmem>>, vector<1x1x17x17xf32>
    %56 = vector.shape_cast %55 : vector<1x1x17x17xf32> to vector<17x17xf32>
    %57 = vector.shape_cast %54 : vector<17x17xf32> to vector<1x1x17x17xf32>
    tpu.vector_store %arg9[%c0_23, %c0_24, %c0_25, %c0_26], %57 {strides = array<i32>} : memref<1x4x17x17xf32, #tpu.memory_space<vmem>>, vector<1x1x17x17xf32>,
    %cst_27 = arith.constant dense<0.000000e+00> : vector<17x8xf32>
    %58 = tpu.matmul %54, %42, %cst_27 {dimension_numbers = #tpu.dot_dimension_numbers<[1], [0], [0], [1], [0, 0, 1, 1], [], []>} : vector<17x17xf32>, vector<17x8xf32>, vector<17x8xf32> -> vector<17x8xf32>
    %59 = vector.extract_strided_slice %36 {offsets = [0, 0], sizes = [8, 32], strides = [1, 1]} : vector<32x32xf32> to vector<8x32xf32>
    %cst_28 = arith.constant dense<0.000000e+00> : vector<17x32xf32>
    %60 = tpu.matmul %58, %59, %cst_28 {dimension_numbers = #tpu.dot_dimension_numbers<[1], [0], [0], [1], [0, 0, 1, 1], [], []>} : vector<17x8xf32>, vector<8x32xf32>, vector<17x32xf32> -> vector<17x32xf32>
    %61 = arith.addf %39, %60 : vector<17x32xf32>
    %62 = vector.extract_strided_slice %33 {offsets = [0, 8], sizes = [17, 8], strides = [1, 1]} : vector<17x32xf32> to vector<17x8xf32>
    %63 = vector.extract_strided_slice %34 {offsets = [0, 8], sizes = [17, 8], strides = [1, 1]} : vector<17x32xf32> to vector<17x8xf32>
    %64 = vector.extract_strided_slice %35 {offsets = [0, 8], sizes = [17, 8], strides = [1, 1]} : vector<17x32xf32> to vector<17x8xf32>
    %65 = tpu.transpose %63, [1, 0] : vector<17x8xf32> -> vector<8x17xf32>
    %cst_29 = arith.constant dense<0.000000e+00> : vector<17x17xf32>
    %66 = tpu.matmul %62, %65, %cst_29 {dimension_numbers = #tpu.dot_dimension_numbers<[1], [0], [0], [1], [0, 0, 1, 1], [], []>} : vector<17x8xf32>, vector<8x17xf32>, vector<17x17xf32> -> vector<17x17xf32>
    %cst_30 = arith.constant dense<0xFF800000> : vector<17xf32>
    %67 = vector.multi_reduction <maximumf>, %66, %cst_30 [1] : vector<17x17xf32> to vector<17xf32>
    %68 = vector.shape_cast %67 : vector<17xf32> to vector<17x1xf32>
    %69 = vector.broadcast %68 : vector<17x1xf32> to vector<17x17xf32>
    %70 = arith.subf %66, %69 : vector<17x17xf32>
    %71 = math.exp %70 : vector<17x17xf32>
    %cst_31 = arith.constant dense<0.000000e+00> : vector<17xf32>
    %72 = vector.multi_reduction <add>, %71, %cst_31 [1] : vector<17x17xf32> to vector<17xf32>
    %73 = vector.shape_cast %72 : vector<17xf32> to vector<17x1xf32>
    %74 = tpu.reciprocal %73 {approx = true} : vector<17x1xf32> -> vector<17x1xf32>
    %75 = vector.broadcast %74 : vector<17x1xf32> to vector<17x17xf32>
    %76 = arith.mulf %71, %75 : vector<17x17xf32>
    %c0_32 = arith.constant 0 : index
    %c1 = arith.constant 1 : index
    %c0_33 = arith.constant 0 : index
    %c0_34 = arith.constant 0 : index
    %77 = vector.load %arg9[%c0_32, %c1, %c0_33, %c0_34] : memref<1x4x17x17xf32, #tpu.memory_space<vmem>>, vector<1x1x17x17xf32>
    %78 = vector.shape_cast %77 : vector<1x1x17x17xf32> to vector<17x17xf32>
    %79 = vector.shape_cast %76 : vector<17x17xf32> to vector<1x1x17x17xf32>
    tpu.vector_store %arg9[%c0_32, %c1, %c0_33, %c0_34], %79 {strides = array<i32>} : memref<1x4x17x17xf32, #tpu.memory_space<vmem>>, vector<1x1x17x17xf32>,
    %cst_35 = arith.constant dense<0.000000e+00> : vector<17x8xf32>
    %80 = tpu.matmul %76, %64, %cst_35 {dimension_numbers = #tpu.dot_dimension_numbers<[1], [0], [0], [1], [0, 0, 1, 1], [], []>} : vector<17x17xf32>, vector<17x8xf32>, vector<17x8xf32> -> vector<17x8xf32>
    %81 = vector.extract_strided_slice %36 {offsets = [8, 0], sizes = [8, 32], strides = [1, 1]} : vector<32x32xf32> to vector<8x32xf32>
    %cst_36 = arith.constant dense<0.000000e+00> : vector<17x32xf32>
    %82 = tpu.matmul %80, %81, %cst_36 {dimension_numbers = #tpu.dot_dimension_numbers<[1], [0], [0], [1], [0, 0, 1, 1], [], []>} : vector<17x8xf32>, vector<8x32xf32>, vector<17x32xf32> -> vector<17x32xf32>
    %83 = arith.addf %61, %82 : vector<17x32xf32>
    %84 = vector.extract_strided_slice %33 {offsets = [0, 16], sizes = [17, 8], strides = [1, 1]} : vector<17x32xf32> to vector<17x8xf32>
    %85 = vector.extract_strided_slice %34 {offsets = [0, 16], sizes = [17, 8], strides = [1, 1]} : vector<17x32xf32> to vector<17x8xf32>
    %86 = vector.extract_strided_slice %35 {offsets = [0, 16], sizes = [17, 8], strides = [1, 1]} : vector<17x32xf32> to vector<17x8xf32>
    %87 = tpu.transpose %85, [1, 0] : vector<17x8xf32> -> vector<8x17xf32>
    %cst_37 = arith.constant dense<0.000000e+00> : vector<17x17xf32>
    %88 = tpu.matmul %84, %87, %cst_37 {dimension_numbers = #tpu.dot_dimension_numbers<[1], [0], [0], [1], [0, 0, 1, 1], [], []>} : vector<17x8xf32>, vector<8x17xf32>, vector<17x17xf32> -> vector<17x17xf32>
    %cst_38 = arith.constant dense<0xFF800000> : vector<17xf32>
    %89 = vector.multi_reduction <maximumf>, %88, %cst_38 [1] : vector<17x17xf32> to vector<17xf32>
    %90 = vector.shape_cast %89 : vector<17xf32> to vector<17x1xf32>
    %91 = vector.broadcast %90 : vector<17x1xf32> to vector<17x17xf32>
    %92 = arith.subf %88, %91 : vector<17x17xf32>
    %93 = math.exp %92 : vector<17x17xf32>
    %cst_39 = arith.constant dense<0.000000e+00> : vector<17xf32>
    %94 = vector.multi_reduction <add>, %93, %cst_39 [1] : vector<17x17xf32> to vector<17xf32>
    %95 = vector.shape_cast %94 : vector<17xf32> to vector<17x1xf32>
    %96 = tpu.reciprocal %95 {approx = true} : vector<17x1xf32> -> vector<17x1xf32>
    %97 = vector.broadcast %96 : vector<17x1xf32> to vector<17x17xf32>
    %98 = arith.mulf %93, %97 : vector<17x17xf32>
    %c0_40 = arith.constant 0 : index
    %c2 = arith.constant 2 : index
    %c0_41 = arith.constant 0 : index
    %c0_42 = arith.constant 0 : index
    %99 = vector.load %arg9[%c0_40, %c2, %c0_41, %c0_42] : memref<1x4x17x17xf32, #tpu.memory_space<vmem>>, vector<1x1x17x17xf32>
    %100 = vector.shape_cast %99 : vector<1x1x17x17xf32> to vector<17x17xf32>
    %101 = vector.shape_cast %98 : vector<17x17xf32> to vector<1x1x17x17xf32>
    tpu.vector_store %arg9[%c0_40, %c2, %c0_41, %c0_42], %101 {strides = array<i32>} : memref<1x4x17x17xf32, #tpu.memory_space<vmem>>, vector<1x1x17x17xf32>,
    %cst_43 = arith.constant dense<0.000000e+00> : vector<17x8xf32>
    %102 = tpu.matmul %98, %86, %cst_43 {dimension_numbers = #tpu.dot_dimension_numbers<[1], [0], [0], [1], [0, 0, 1, 1], [], []>} : vector<17x17xf32>, vector<17x8xf32>, vector<17x8xf32> -> vector<17x8xf32>
    %103 = vector.extract_strided_slice %36 {offsets = [16, 0], sizes = [8, 32], strides = [1, 1]} : vector<32x32xf32> to vector<8x32xf32>
    %cst_44 = arith.constant dense<0.000000e+00> : vector<17x32xf32>
    %104 = tpu.matmul %102, %103, %cst_44 {dimension_numbers = #tpu.dot_dimension_numbers<[1], [0], [0], [1], [0, 0, 1, 1], [], []>} : vector<17x8xf32>, vector<8x32xf32>, vector<17x32xf32> -> vector<17x32xf32>
    %105 = arith.addf %83, %104 : vector<17x32xf32>
    %106 = vector.extract_strided_slice %33 {offsets = [0, 24], sizes = [17, 8], strides = [1, 1]} : vector<17x32xf32> to vector<17x8xf32>
    %107 = vector.extract_strided_slice %34 {offsets = [0, 24], sizes = [17, 8], strides = [1, 1]} : vector<17x32xf32> to vector<17x8xf32>
    %108 = vector.extract_strided_slice %35 {offsets = [0, 24], sizes = [17, 8], strides = [1, 1]} : vector<17x32xf32> to vector<17x8xf32>
    %109 = tpu.transpose %107, [1, 0] : vector<17x8xf32> -> vector<8x17xf32>
    %cst_45 = arith.constant dense<0.000000e+00> : vector<17x17xf32>
    %110 = tpu.matmul %106, %109, %cst_45 {dimension_numbers = #tpu.dot_dimension_numbers<[1], [0], [0], [1], [0, 0, 1, 1], [], []>} : vector<17x8xf32>, vector<8x17xf32>, vector<17x17xf32> -> vector<17x17xf32>
    %cst_46 = arith.constant dense<0xFF800000> : vector<17xf32>
    %111 = vector.multi_reduction <maximumf>, %110, %cst_46 [1] : vector<17x17xf32> to vector<17xf32>
    %112 = vector.shape_cast %111 : vector<17xf32> to vector<17x1xf32>
    %113 = vector.broadcast %112 : vector<17x1xf32> to vector<17x17xf32>
    %114 = arith.subf %110, %113 : vector<17x17xf32>
    %115 = math.exp %114 : vector<17x17xf32>
    %cst_47 = arith.constant dense<0.000000e+00> : vector<17xf32>
    %116 = vector.multi_reduction <add>, %115, %cst_47 [1] : vector<17x17xf32> to vector<17xf32>
    %117 = vector.shape_cast %116 : vector<17xf32> to vector<17x1xf32>
    %118 = tpu.reciprocal %117 {approx = true} : vector<17x1xf32> -> vector<17x1xf32>
    %119 = vector.broadcast %118 : vector<17x1xf32> to vector<17x17xf32>
    %120 = arith.mulf %115, %119 : vector<17x17xf32>
    %c0_48 = arith.constant 0 : index
    %c3 = arith.constant 3 : index
    %c0_49 = arith.constant 0 : index
    %c0_50 = arith.constant 0 : index
    %121 = vector.load %arg9[%c0_48, %c3, %c0_49, %c0_50] : memref<1x4x17x17xf32, #tpu.memory_space<vmem>>, vector<1x1x17x17xf32>
    %122 = vector.shape_cast %121 : vector<1x1x17x17xf32> to vector<17x17xf32>
    %123 = vector.shape_cast %120 : vector<17x17xf32> to vector<1x1x17x17xf32>
    tpu.vector_store %arg9[%c0_48, %c3, %c0_49, %c0_50], %123 {strides = array<i32>} : memref<1x4x17x17xf32, #tpu.memory_space<vmem>>, vector<1x1x17x17xf32>,
    %cst_51 = arith.constant dense<0.000000e+00> : vector<17x8xf32>
    %124 = tpu.matmul %120, %108, %cst_51 {dimension_numbers = #tpu.dot_dimension_numbers<[1], [0], [0], [1], [0, 0, 1, 1], [], []>} : vector<17x17xf32>, vector<17x8xf32>, vector<17x8xf32> -> vector<17x8xf32>
    %125 = vector.extract_strided_slice %36 {offsets = [24, 0], sizes = [8, 32], strides = [1, 1]} : vector<32x32xf32> to vector<8x32xf32>
    %cst_52 = arith.constant dense<0.000000e+00> : vector<17x32xf32>
    %126 = tpu.matmul %124, %125, %cst_52 {dimension_numbers = #tpu.dot_dimension_numbers<[1], [0], [0], [1], [0, 0, 1, 1], [], []>} : vector<17x8xf32>, vector<8x32xf32>, vector<17x32xf32> -> vector<17x32xf32>
    %127 = arith.addf %105, %126 : vector<17x32xf32>
    %c0_53 = arith.constant 0 : index
    %c0_54 = arith.constant 0 : index
    %c0_55 = arith.constant 0 : index
    %128 = vector.load %arg8[%c0_53, %c0_54, %c0_55] : memref<1x17x32xf32, #tpu.memory_space<vmem>>, vector<1x17x32xf32>
    %129 = vector.shape_cast %128 : vector<1x17x32xf32> to vector<17x32xf32>
    %130 = vector.shape_cast %127 : vector<17x32xf32> to vector<1x17x32xf32>
    tpu.vector_store %arg8[%c0_53, %c0_54, %c0_55], %130 {strides = array<i32>} : memref<1x17x32xf32, #tpu.memory_space<vmem>>, vector<1x17x32xf32>,
    return
  }
  func.func @transform_0(%arg0: i32) -> (i32, i32, i32) {
    %c0_i32 = arith.constant 0 : i32
    %c0_i32_0 = arith.constant 0 : i32
    %c0_i32_1 = arith.constant 0 : i32
    return %arg0, %c0_i32, %c0_i32_0 : i32, i32, i32
  }
  func.func @transform_1(%arg0: i32) -> (i32, i32) {
    %c0_i32 = arith.constant 0 : i32
    %c0_i32_0 = arith.constant 0 : i32
    %c0_i32_1 = arith.constant 0 : i32
    return %c0_i32, %c0_i32_0 : i32, i32
  }
  func.func @transform_2(%arg0: i32) -> (i32, i32) {
    %c0_i32 = arith.constant 0 : i32
    %c0_i32_0 = arith.constant 0 : i32
    %c0_i32_1 = arith.constant 0 : i32
    return %c0_i32, %c0_i32_0 : i32, i32
  }
  func.func @transform_3(%arg0: i32) -> (i32, i32) {
    %c0_i32 = arith.constant 0 : i32
    %c0_i32_0 = arith.constant 0 : i32
    %c0_i32_1 = arith.constant 0 : i32
    return %c0_i32, %c0_i32_0 : i32, i32
  }
  func.func @transform_4(%arg0: i32) -> (i32, i32) {
    %c0_i32 = arith.constant 0 : i32
    %c0_i32_0 = arith.constant 0 : i32
    %c0_i32_1 = arith.constant 0 : i32
    return %c0_i32, %c0_i32_0 : i32, i32
  }
  func.func @transform_5(%arg0: i32) -> (i32, i32) {
    %c0_i32 = arith.constant 0 : i32
    %c0_i32_0 = arith.constant 0 : i32
    %c0_i32_1 = arith.constant 0 : i32
    return %c0_i32, %c0_i32_0 : i32, i32
  }
  func.func @transform_6(%arg0: i32) -> (i32, i32) {
    %c0_i32 = arith.constant 0 : i32
    %c0_i32_0 = arith.constant 0 : i32
    %c0_i32_1 = arith.constant 0 : i32
    return %c0_i32, %c0_i32_0 : i32, i32
  }
  func.func @transform_7(%arg0: i32) -> (i32, i32, i32) {
    %c0_i32 = arith.constant 0 : i32
    %c0_i32_0 = arith.constant 0 : i32
    %c0_i32_1 = arith.constant 0 : i32
    return %arg0, %c0_i32, %c0_i32_0 : i32, i32, i32
  }
  func.func @transform_8(%arg0: i32) -> (i32, i32, i32, i32) {
    %c0_i32 = arith.constant 0 : i32
    %c0_i32_0 = arith.constant 0 : i32
    %c0_i32_1 = arith.constant 0 : i32
    %c0_i32_2 = arith.constant 0 : i32
    return %arg0, %c0_i32, %c0_i32_0, %c0_i32_1 : i32, i32, i32, i32
  }
}

module attributes {stable_mosaic.version = 11 : i64} {
  func.func @_head_kernel(%arg0: i32, %arg1: memref<2x32xf32, #tpu.memory_space<vmem>>, %arg2: memref<1x32xf32, #tpu.memory_space<vmem>>, %arg3: memref<1x32xf32, #tpu.memory_space<vmem>>, %arg4: memref<32x10xf32, #tpu.memory_space<vmem>>, %arg5: memref<1x10xf32, #tpu.memory_space<vmem>>, %arg6: memref<2x10xf32, #tpu.memory_space<vmem>>) attributes {dimension_semantics = [#tpu.dimension_semantics<arbitrary>], iteration_bounds = array<i64: 1>, scalar_prefetch = 0 : i64, scratch_operands = 0 : i64, tpu.core_type = #tpu.core_type<tc>, window_params = [{pipeline_mode = #tpu.pipeline_mode<synchronous>, transform_indices = @transform_0, window_bounds = array<i64: 2, 32>}, {pipeline_mode = #tpu.pipeline_mode<synchronous>, transform_indices = @transform_1, window_bounds = array<i64: 1, 32>}, {pipeline_mode = #tpu.pipeline_mode<synchronous>, transform_indices = @transform_2, window_bounds = array<i64: 1, 32>}, {pipeline_mode = #tpu.pipeline_mode<synchronous>, transform_indices = @transform_3, window_bounds = array<i64: 32, 10>}, {pipeline_mode = #tpu.pipeline_mode<synchronous>, transform_indices = @transform_4, window_bounds = array<i64: 1, 10>}, {pipeline_mode = #tpu.pipeline_mode<synchronous>, transform_indices = @transform_5, window_bounds = array<i64: 2, 10>}]} {
    %c0 = arith.constant 0 : index
    %c0_0 = arith.constant 0 : index
    %0 = vector.load %arg1[%c0, %c0_0] : memref<2x32xf32, #tpu.memory_space<vmem>>, vector<2x32xf32>
    %cst = arith.constant dense<0.000000e+00> : vector<2xf32>
    %1 = vector.multi_reduction <add>, %0, %cst [1] : vector<2x32xf32> to vector<2xf32>
    %2 = vector.shape_cast %1 : vector<2xf32> to vector<2x1xf32>
    %cst_1 = arith.constant 3.200000e+01 : f32
    %3 = vector.broadcast %cst_1 : f32 to vector<2x1xf32>
    %4 = arith.divf %2, %3 : vector<2x1xf32>
    %5 = vector.broadcast %4 : vector<2x1xf32> to vector<2x32xf32>
    %6 = arith.subf %0, %5 : vector<2x32xf32>
    %7 = arith.mulf %6, %6 : vector<2x32xf32>
    %cst_2 = arith.constant dense<0.000000e+00> : vector<2xf32>
    %8 = vector.multi_reduction <add>, %7, %cst_2 [1] : vector<2x32xf32> to vector<2xf32>
    %9 = vector.shape_cast %8 : vector<2xf32> to vector<2x1xf32>
    %cst_3 = arith.constant 3.200000e+01 : f32
    %10 = vector.broadcast %cst_3 : f32 to vector<2x1xf32>
    %11 = arith.divf %9, %10 : vector<2x1xf32>
    %12 = vector.broadcast %4 : vector<2x1xf32> to vector<2x32xf32>
    %13 = arith.subf %0, %12 : vector<2x32xf32>
    %cst_4 = arith.constant 9.99999974E-6 : f32
    %14 = vector.broadcast %cst_4 : f32 to vector<2x1xf32>
    %15 = arith.addf %11, %14 : vector<2x1xf32>
    %16 = math.rsqrt %15 : vector<2x1xf32>
    %17 = vector.broadcast %16 : vector<2x1xf32> to vector<2x32xf32>
    %18 = arith.mulf %13, %17 : vector<2x32xf32>
    %c0_5 = arith.constant 0 : index
    %c0_6 = arith.constant 0 : index
    %19 = vector.load %arg2[%c0_5, %c0_6] : memref<1x32xf32, #tpu.memory_space<vmem>>, vector<1x32xf32>
    %20 = vector.broadcast %19 : vector<1x32xf32> to vector<2x32xf32>
    %21 = arith.mulf %18, %20 : vector<2x32xf32>
    %c0_7 = arith.constant 0 : index
    %c0_8 = arith.constant 0 : index
    %22 = vector.load %arg3[%c0_7, %c0_8] : memref<1x32xf32, #tpu.memory_space<vmem>>, vector<1x32xf32>
    %23 = vector.broadcast %22 : vector<1x32xf32> to vector<2x32xf32>
    %24 = arith.addf %21, %23 : vector<2x32xf32>
    %c0_9 = arith.constant 0 : index
    %c0_10 = arith.constant 0 : index
    %25 = vector.load %arg4[%c0_9, %c0_10] : memref<32x10xf32, #tpu.memory_space<vmem>>, vector<32x10xf32>
    %cst_11 = arith.constant dense<0.000000e+00> : vector<2x10xf32>
    %26 = tpu.matmul %24, %25, %cst_11 {dimension_numbers = #tpu.dot_dimension_numbers<[1], [0], [0], [1], [0, 0, 1, 1], [], []>} : vector<2x32xf32>, vector<32x10xf32>, vector<2x10xf32> -> vector<2x10xf32>
    %c0_12 = arith.constant 0 : index
    %c0_13 = arith.constant 0 : index
    %27 = vector.load %arg5[%c0_12, %c0_13] : memref<1x10xf32, #tpu.memory_space<vmem>>, vector<1x10xf32>
    %28 = vector.broadcast %27 : vector<1x10xf32> to vector<2x10xf32>
    %29 = arith.addf %26, %28 : vector<2x10xf32>
    %c0_14 = arith.constant 0 : index
    %c0_15 = arith.constant 0 : index
    %30 = vector.load %arg6[%c0_14, %c0_15] : memref<2x10xf32, #tpu.memory_space<vmem>>, vector<2x10xf32>
    tpu.vector_store %arg6[%c0_14, %c0_15], %29 {strides = array<i32>} : memref<2x10xf32, #tpu.memory_space<vmem>>, vector<2x10xf32>,
    return
  }
  func.func @transform_0(%arg0: i32) -> (i32, i32) {
    %c0_i32 = arith.constant 0 : i32
    %c0_i32_0 = arith.constant 0 : i32
    %c0_i32_1 = arith.constant 0 : i32
    return %c0_i32, %c0_i32_0 : i32, i32
  }
  func.func @transform_1(%arg0: i32) -> (i32, i32) {
    %c0_i32 = arith.constant 0 : i32
    %c0_i32_0 = arith.constant 0 : i32
    %c0_i32_1 = arith.constant 0 : i32
    return %c0_i32, %c0_i32_0 : i32, i32
  }
  func.func @transform_2(%arg0: i32) -> (i32, i32) {
    %c0_i32 = arith.constant 0 : i32
    %c0_i32_0 = arith.constant 0 : i32
    %c0_i32_1 = arith.constant 0 : i32
    return %c0_i32, %c0_i32_0 : i32, i32
  }
  func.func @transform_3(%arg0: i32) -> (i32, i32) {
    %c0_i32 = arith.constant 0 : i32
    %c0_i32_0 = arith.constant 0 : i32
    %c0_i32_1 = arith.constant 0 : i32
    return %c0_i32, %c0_i32_0 : i32, i32
  }
  func.func @transform_4(%arg0: i32) -> (i32, i32) {
    %c0_i32 = arith.constant 0 : i32
    %c0_i32_0 = arith.constant 0 : i32
    %c0_i32_1 = arith.constant 0 : i32
    return %c0_i32, %c0_i32_0 : i32, i32
  }
  func.func @transform_5(%arg0: i32) -> (i32, i32) {
    %c0_i32 = arith.constant 0 : i32
    %c0_i32_0 = arith.constant 0 : i32
    %c0_i32_1 = arith.constant 0 : i32
    return %c0_i32, %c0_i32_0 : i32, i32
  }
}

</mosaic_0001>

<bundles_post_ra>
// kernel: vit_forward.4
= control target key start
LH: loop header
LB: loop body
LE: loop exit
PB: predicated region body
PF: predicated region fallthrough
CT: control target
= control target key end

     0   :  { %vm33_vm0 = vcmask 523264   ;;  %vm131_vm1 = vcmask 261120   ;;  %s266_s1 = inlined_call_operand.vmem [shape: f32[64,32], index: 1, kind: input, shape index: {}]   ;;  %s267_s0 = inlined_call_operand.vmem [shape: f32[32,64], index: 0, kind: input, shape index: {}]   ;;  %s268_s2 = inlined_call_operand.vmem [shape: f32[1,32], index: 2, kind: input, shape index: {}]   ;;  %s269_s3 = inlined_call_operand.vmem [shape: f32[32,32], index: 3, kind: output, shape index: {}]  }
   0x1   :  { %v25_v0 = vld [vmem:[%s266_s1 + $0x38] sm:$0xff]  ;;  %v24_v1 = vld [vmem:[%s266_s1 + $0x30] sm:$0xff]  ;;  %v23_v2 = vld [vmem:[%s266_s1 + $0x28] sm:$0xff] }
   0x2   :  { %157 = vmatprep.subr.mxu0 %v25_v0  ;;  %179 = vmatprep.subr.mxu1 %v25_v0  ;;  %v22_v3 = vld [vmem:[%s266_s1 + $0x20] sm:$0xff]  ;;  %v21_v4 = vld [vmem:[%s266_s1 + $0x18] sm:$0xff]  ;;  %v20_v5 = vld [vmem:[%s266_s1 + $0x10] sm:$0xff] }
   0x3   :  { %158 = vmatpush3.msra.mxu0 %v25_v0  ;;  %187 = vmatpush3.msra.mxu1 %v25_v0  ;;  %v19_v6 = vld [vmem:[%s266_s1 + $0x8] sm:$0xff]  ;;  %v18_v7 = vld [vmem:[%s266_s1] sm:$0xff]  ;;  %v16_v9 = vld [vmem:[%s267_s0 + $0x10] sm:$0xff] }
   0x4   :  { %159 = vmatprep.subr.mxu0 %v24_v1  ;;  %180 = vmatprep.subr.mxu1 %v24_v1  ;;  %v14_v8 = vld [vmem:[%s267_s0] sm:$0xff]  ;;  %v15_v10 = vld [vmem:[%s267_s0 + $0x8] sm:$0xff]  ;;  %v17_v11 = vld [vmem:[%s267_s0 + $0x18] sm:$0xff] }
   0x5   :  { %160 = vmatpush3.msra.mxu0 %v24_v1  ;;  %188 = vmatpush3.msra.mxu1 %v24_v1  ;;  %v140_v12 = vld [vmem:[%s268_s2] ss:$0 sm:$0xff] }
   0x6   :  { %161 = vmatprep.subr.mxu0 %v23_v2  ;;  %181 = vmatprep.subr.mxu1 %v23_v2 }
   0x7   :  { %162 = vmatpush3.msra.mxu0 %v23_v2  ;;  %189 = vmatpush3.msra.mxu1 %v23_v2 }
   0x8   :  { %163 = vmatprep.subr.mxu0 %v22_v3  ;;  %182 = vmatprep.subr.mxu1 %v22_v3 }
   0x9   :  { %164 = vmatpush3.msra.mxu0 %v22_v3  ;;  %190 = vmatpush3.msra.mxu1 %v22_v3 }
   0xa   :  { %165 = vmatprep.subr.mxu0 %v21_v4  ;;  %183 = vmatprep.subr.mxu1 %v21_v4 }
   0xb   :  { %166 = vmatpush3.msra.mxu0 %v21_v4  ;;  %191 = vmatpush3.msra.mxu1 %v21_v4 }
   0xc   :  { %167 = vmatprep.subr.mxu0 %v20_v5  ;;  %184 = vmatprep.subr.mxu1 %v20_v5 }
   0xd   :  { %168 = vmatpush3.msra.mxu0 %v20_v5  ;;  %192 = vmatpush3.msra.mxu1 %v20_v5 }
   0xe   :  { %169 = vmatprep.subr.mxu0 %v19_v6  ;;  %185 = vmatprep.subr.mxu1 %v19_v6 }
   0xf   :  { %170 = vmatpush3.msra.mxu0 %v19_v6  ;;  %193 = vmatpush3.msra.mxu1 %v19_v6 }
  0x10   :  { %171 = vmatprep.subr.mxu0 %v18_v7  ;;  %186 = vmatprep.subr.mxu1 %v18_v7 }
  0x11   :  { %172 = vmatpush3.msra.mxu0 %v18_v7  ;;  %194 = vmatpush3.msra.mxu1 %v18_v7 }
  0x12   :  { %173 = vmatprep.mubr.msk.f32.mxu0 %vm33_vm0, %v14_v8  ;;  %176 = vmatprep.mubr.msk.f32.mxu1 %vm33_vm0, %v16_v9 }
  0x13   :  { %174 = vmatmul.mubr.msk.f32.vlgmr.msra.gmra.mxu0 %vm33_vm0, %v15_v10  ;;  %177 = vmatmul.mubr.msk.f32.vlgmr.msra.gmra.mxu1 %vm33_vm0, %v17_v11 }
  0xd3   :  { %v175_v13 = vpop.f32.mrf.mxu0  ;;  %v178_v14 = vpop.f32.mrf.mxu1 }
  0xd4   :  { %v118_v15 = vadd.f32 %v175_v13, %v140_v12  ;;  %v128_v16 = vadd.f32 %v178_v14, %v140_v12 }
  0xd5   :  { %v112_v17 = vpop.f32.mrf.mxu0  ;;  %v122_v18 = vpop.f32.mrf.mxu1 }
  0xd6   :  { %133 = vst.msk [vmem:[%s269_s3 + $0x8] sm:$0xff] %vm131_vm1, %v118_v15  ;;  %135 = vst.msk [vmem:[%s269_s3 + $0x18] sm:$0xff] %vm131_vm1, %v128_v16  ;;  %v113_v19 = vadd.f32 %v140_v12, %v112_v17  ;;  %v123_v20 = vadd.f32 %v140_v12, %v122_v18 }
  0xd8   :  { %132 = vst.msk [vmem:[%s269_s3] sm:$0xff] %vm131_vm1, %v113_v19  ;;  %134 = vst.msk [vmem:[%s269_s3 + $0x10] sm:$0xff] %vm131_vm1, %v123_v20 }

// kernel: vit_forward.5
= control target key start
LH: loop header
LB: loop body
LE: loop exit
PB: predicated region body
PF: predicated region fallthrough
CT: control target
= control target key end

     0   :  { %s2398_s27 = smov 0   ;;  %s2786_s0 = inlined_call_operand.vmem [shape: f32[2,17,32], index: 0, kind: input, shape index: {}]   ;;  %s2787_s1 = inlined_call_operand.vmem [shape: f32[1,32], index: 1, kind: input, shape index: {}]   ;;  %s2788_s2 = inlined_call_operand.vmem [shape: f32[1,32], index: 2, kind: input, shape index: {}]   ;;  %s2789_s3 = inlined_call_operand.vmem [shape: f32[32,96], index: 3, kind: input, shape index: {}]   ;;  %s2790_s4 = inlined_call_operand.vmem [shape: f32[1,96], index: 4, kind: input, shape index: {}]   ;;  %s2791_s5 = inlined_call_operand.vmem [shape: f32[32,32], index: 5, kind: input, shape index: {}]   ;;  %s2792_s6 = inlined_call_operand.vmem [shape: f32[1,32], index: 6, kind: input, shape index: {}]   ;;  %s2793_s7 = inlined_call_operand.vmem [shape: f32[2,17,32], index: 7, kind: output, shape index: {0}]   ;;  %s2794_s8 = inlined_call_operand.vmem [shape: f32[2,4,17,17], index: 8, kind: output, shape index: {1}]  }
   0x1 LB: > { %s1923_s28 = sadd.s32 4294967295, %s2338_s27   ;;  %p1927_p0 = scmp.ge.s32.totalorder %s2338_s27, 1  ;;  %s2338_s27 = sphi %s2398_s27, %s19_s27  }
   0x2   : > { %p265_p1 = scmp.lt.s32.totalorder %s2338_s27, 3 }
   0x4   : > { %p266_p2 = pnand %p1927_p0, %p265_p1 }
   0x5   : > { %p304_p3 = scmp.lt.s32.totalorder (!%p266_p2), %s1923_s28, 1  ;;  %s2342_s25 = smov (!%p266_p2), 96  }
   0x6   : > { %269 = sbr.rel (%p266_p2) target bundleno = 3197 (0xc7d), region = 48  ;;  %s2343_s26 = smov (!%p266_p2), 64  }
   0x7   : > { %s2344_s30 = smov (!%p266_p2), 88   ;;  %s2345_s9 = smov (!%p266_p2), 120  }
   0x8   : > { %s2346_s16 = smov (!%p266_p2), 56   ;;  %s2347_s17 = smov (!%p266_p2), 80  }
   0x9   : > { %s2348_s18 = smov (!%p266_p2), 112   ;;  %s2349_s21 = smov (!%p266_p2), 48  }
   0xa   : > { %s2350_s22 = smov (!%p266_p2), 72  }
   0xb   : > { %s2796_s28 = smov (!%p304_p3, %s1923_s28), 1  ;;  %vm322_vm0 = vcmask 261120   ;;  %vm329_vm1 = vcmask 253952   ;;  %v387_v21 = vld [vmem:[%s2789_s3 + $0x18] sm:$0xff]  ;;  %v2340_v22 = vmov 0.0   ;;  %v386_v23 = vld [vmem:[%s2789_s3 + $0x10] sm:$0xff] }
   0xc   : > { %s2255_s29 = smul.u32 24, %s2796_s28  ;;  %2072 = vmatprep.subr.mxu0 %v2340_v22  ;;  %vm2341_vm2 = vmmov 0   ;;  %2089 = vmatprep.subr.mxu1 %v2340_v22  ;;  %v385_v24 = vld [vmem:[%s2789_s3 + $0x8] sm:$0xff]  ;;  %v384_v25 = vld [vmem:[%s2789_s3] sm:$0xff]  ;;  %vm510_vm3 = vcmask 64512   ;;  %vm606_vm4 = vcmask 138240  }
   0xd   : > { %2080 = vmatprep.mubr.msk.f32.mxu0 %vm2341_vm2, %v2340_v22  ;;  %2073 = vmatpush3.msra.mxu0 %v387_v21  ;;  %v1931_v36 = vld [vmem:[%s2787_s1] ss:$0 sm:$0xff]  ;;  %vm613_vm5 = vcmask 131072   ;;  %vm661_vm6 = vcmask 1040384  }
   0xe   : > { %s308_s10 = scalar_lea.vmem %s2786_s0, %s2255_s29  ;;  %2074 = vmatprep.subr.mxu0 %v2340_v22  ;;  %2095 = vmatprep.mubr.msk.f32.mxu1 %vm2341_vm2, %v2340_v22  ;;  %v1932_v38 = vld [vmem:[%s2788_s2] ss:$0 sm:$0xff]  ;;  %s313_s14 = scalar_lea.vmem %s2793_s7, %s2255_s29 }
   0xf   : > { %v2414_v0 = vld [vmem:[%s308_s10] sm:$0xff]  ;;  %v2416_v1 = vld [vmem:[%s308_s10 + $0x10] sm:$0x1]  ;;  %v2418_v2 = vld [vmem:[%s308_s10 + $0x8] sm:$0xff]  ;;  %2075 = vmatpush3.msra.mxu0 %v386_v23  ;;  %s2256_s10 = smul.u32 96, %s2796_s28 }
  0x10   : > { %v323_v3 = vsel %vm322_vm0, %v2414_v0, 0.0  ;;  %v330_v4 = vsel %vm329_vm1, %v2416_v1, 0.0  ;;  %v326_v5 = vsel %vm322_vm0, %v2418_v2, 0.0  ;;  %2076 = vmatprep.subr.mxu0 %v2340_v22  ;;  %v1933_v51 = vld [vmem:[%s2790_s4] ss:$0 sm:$0xff] }
  0x11   : > { %324 = vadd.xlane.f32.xlu0 %v323_v3  ;;  %331 = vadd.xlane.f32.xlu1 %v330_v4  ;;  %s2534_s13 = scalar_lea.vmem %s2794_s8, %s2256_s10 }
  0x12   : > { %2077 = vmatpush3.msra.mxu0 %v385_v24 }
  0x13   : > { %2078 = vmatprep.subr.mxu0 %v2340_v22 }
  0x14   : > { %2079 = vmatpush3.msra.mxu0 %v384_v25 }
  0x15   : > { %327 = vadd.xlane.f32.xlu0 %v326_v5  ;;  %2104 = vmatprep.subr.mxu0 %v2340_v22 }
  0x9a   : > { %v325_v6 = vpop.xlane.xlu0 %324  ;;  %v332_v7 = vpop.xlane.xlu1 %331 }
  0x9b   : > { %v334_v8 = vmul.f32 0.03125, %v325_v6  ;;  %v336_v9 = vmul.f32 0.03125, %v332_v7 }
  0x9d   : > { %v337_v10 = vsub.f32 %v2414_v0, %v334_v8  ;;  %v339_v11 = vsub.f32 %v2416_v1, %v336_v9 }
  0x9e   : > { %v328_v12 = vpop.xlane.xlu0 %327 }
  0x9f   : > { %v335_v13 = vmul.f32 0.03125, %v328_v12  ;;  %v340_v14 = vmul.f32 %v337_v10, %v337_v10  ;;  %v342_v15 = vmul.f32 %v339_v11, %v339_v11 }
  0xa1   : > { %v338_v16 = vsub.f32 %v2418_v2, %v335_v13  ;;  %v343_v17 = vsel %vm322_vm0, %v340_v14, 0.0  ;;  %v349_v18 = vsel %vm329_vm1, %v342_v15, 0.0 }
  0xa2   : > { %344 = vadd.xlane.f32.xlu1 %v343_v17 }
  0xa3   : > { %v341_v19 = vmul.f32 %v338_v16, %v338_v16 }
  0xa5   : > { %v346_v20 = vsel %vm322_vm0, %v341_v19, 0.0 }
  0xa6   : > { %350 = vadd.xlane.f32.xlu1 %v349_v18  ;;  %347 = vadd.xlane.f32.xlu0 %v346_v20 }
 0x12b   : > { %v345_v26 = vpop.xlane.xlu1 %344 }
 0x12c   : > { %v352_v27 = vmul.f32 0.03125, %v345_v26 }
 0x12e   : > { %v355_v28 = vadd.f32 1e-05, %v352_v27 }
 0x12f   : > { %v351_v29 = vpop.xlane.xlu1 %350  ;;  %v348_v30 = vpop.xlane.xlu0 %347 }
 0x130   : > { %2278 = vrsqrt.f32 %v355_v28  ;;  %v354_v31 = vmul.f32 0.03125, %v351_v29  ;;  %v353_v32 = vmul.f32 0.03125, %v348_v30 }
 0x132   : > { %v357_v33 = vadd.f32 1e-05, %v354_v31  ;;  %v356_v34 = vadd.f32 1e-05, %v353_v32 }
 0x134   : > { %2280 = vrsqrt.f32 %v357_v33 }
 0x135   : > { %2282 = vrsqrt.f32 %v356_v34 }
 0x13d   : > { %v2279_v35 = vpop.eup %2278 }
 0x13e   : > { %v361_v37 = vmul.f32 %v2279_v35, %v337_v10 }
 0x140   : > { %v371_v39 = vmul.f32 %v1931_v36, %v361_v37 }
 0x141   : > { %v2281_v40 = vpop.eup %2280 }
 0x142   : > { %v2283_v41 = vpop.eup %2282  ;;  %v381_v42 = vadd.f32 %v1932_v38, %v371_v39  ;;  %v363_v44 = vmul.f32 %v2281_v40, %v339_v11 }
 0x143   : > { %v362_v43 = vmul.f32 %v2283_v41, %v338_v16 }
 0x144   : > { %2081 = vmatmul.mubr.msk.f32.vlgmr.msra.gmra.mxu0 %vm322_vm0, %v381_v42  ;;  %v373_v47 = vmul.f32 %v1931_v36, %v363_v44 }
 0x145   : > { %2083 = vmatprep.mubr.msk.f32.mxu0 %vm2341_vm2, %v2340_v22  ;;  %v372_v45 = vmul.f32 %v1931_v36, %v362_v43 }
 0x146   : > { %v383_v48 = vadd.f32 %v1932_v38, %v373_v47  ;;  %v487_v47 = vld [vmem:[%s2791_s5] sm:$0xff] }
 0x147   : > { %v382_v46 = vadd.f32 %v1932_v38, %v372_v45 }
 0x149   : > { %2084 = vmatmul.mubr.msk.f32.gmra.mxu0 %vm322_vm0, %v382_v46 }
 0x14a   : > { %2086 = vmatprep.mubr.msk.f32.mxu0 %vm2341_vm2, %v2340_v22 }
 0x14d   : > { %2087 = vmatmul.mubr.msk.f32.gmra.mxu0 %vm322_vm0, %v383_v48 }
 0x14e   : > { %2110 = vmatprep.mubr.msk.f32.mxu0 %vm2341_vm2, %v2340_v22 }
 0x204   : > { %v470_v49 = vpop.f32.mrf.mxu0 }
 0x205   : > { %v2475_v56 = vadd.f32 %v1933_v51, %v470_v49 }
 0x206   : > { %v2082_v50 = vpop.f32.mrf.mxu0 }
 0x207   : > { %v2487_v62 = vmul.f32 0.35355338, %v2475_v56 }
 0x209   : > { %v475_v52 = vpop.f32.mrf.mxu0 }
 0x20a   : > { %v2472_v53 = vadd.f32 %v1933_v51, %v475_v52 }
 0x20b   : > { %v2085_v54 = vpop.f32.mrf.mxu0 }
 0x20c   : > { %506 = vrot.lane.b32.xlu1 %v2472_v53, %s2342_s25  ;;  %v2495_v63 = vmul.f32 0.35355338, %v2472_v53 }
 0x20d   : > { %v480_v55 = vpop.f32.mrf.mxu0 }
 0x20e   : > { %v2477_v57 = vadd.f32 %v1933_v51, %v480_v55 }
 0x20f   : > { %v2088_v58 = vpop.f32.mrf.mxu0 }
 0x210   : > { %504 = vrot.lane.b32.xlu1 %v2475_v56, %s2342_s25  ;;  %508 = vrot.lane.b32.xlu0 %v2477_v57, %s2342_s25  ;;  %v2502_v3 = vmul.f32 0.35355338, %v2477_v57  ;;  %s2351_s25 = smov 104  }
 0x27e   : > { %v507_v60 = vpop.permute.xlu1 %506 }
 0x282   : > { %v509_v59 = vpop.permute.xlu0 %508  ;;  %v505_v61 = vpop.permute.xlu1 %504 }
 0x283   : > { %2090 = vmatpush3.xpose.msk.msra.mxu1 %vm510_vm3, %v509_v59 }
 0x284   : > { %2091 = vmatprep.subr.mxu1 %v2340_v22 }
 0x287   : > { %2092 = vmatpush3.xpose.msk.msra.mxu1 %vm510_vm3, %v507_v60 }
 0x288   : > { %2093 = vmatprep.subr.mxu1 %v2340_v22 }
 0x28b   : > { %2094 = vmatpush3.xpose.msk.msra.mxu1 %vm510_vm3, %v505_v61 }
 0x28c   : > { %2119 = vmatprep.subr.mxu1 %v2340_v22 }
 0x28e   : > { %2096 = vmatmul.mubr.msk.f32.vlgmr.msra.gmra.mxu1 %vm510_vm3, %v2487_v62 }
 0x28f   : > { %2098 = vmatprep.mubr.msk.f32.mxu1 %vm2341_vm2, %v2340_v22  ;;  %2120 = vmatpush3.msra.mxu1 %v487_v47 }
 0x290   : > { %2145 = vmatprep.subr.mxu1 %v2340_v22 }
 0x292   : > { %2099 = vmatmul.mubr.msk.f32.gmra.mxu1 %vm510_vm3, %v2495_v63 }
 0x293   : > { %2101 = vmatprep.mubr.msk.f32.mxu1 %vm2341_vm2, %v2340_v22 }
 0x296   : > { %2102 = vmatmul.mubr.msk.f32.gmra.mxu1 %vm510_vm3, %v2502_v3 }
 0x297   : > { %2121 = vmatprep.mubr.msk.f32.mxu1 %vm2341_vm2, %v2340_v22 }
 0x34e   : > { %v592_v4 = vpop.f32.mrf.mxu1 }
 0x34f   : > { %v607_v5 = vsel %vm606_vm4, %v592_v4, -inf }
 0x350   : > { %608 = vmax.xlane.f32.xlu1 %v607_v5  ;;  %v2097_v6 = vpop.f32.mrf.mxu1 }
 0x352   : > { %v597_v7 = vpop.f32.mrf.mxu1 }
 0x353   : > { %v610_v8 = vsel %vm606_vm4, %v597_v7, -inf }
 0x354   : > { %611 = vmax.xlane.f32.xlu0 %v610_v8  ;;  %v2100_v9 = vpop.f32.mrf.mxu1 }
 0x356   : > { %v602_v10 = vpop.f32.mrf.mxu1 }
 0x357   : > { %v614_v11 = vsel %vm613_vm5, %v602_v10, -inf }
 0x358   : > { %615 = vmax.xlane.f32.xlu0 %v614_v11  ;;  %v2103_v12 = vpop.f32.mrf.mxu1 }
 0x361   : > { %648 = vrot.lane.b32.xlu1 %v2477_v57, %s2343_s26 }
 0x365   : > { %644 = vrot.lane.b32.xlu1 %v2475_v56, %s2343_s26 }
 0x369   : > { %846 = vrot.lane.b32.xlu1 %v2477_v57, %s2344_s30 }
 0x36d   : > { %844 = vrot.lane.b32.xlu1 %v2472_v53, %s2344_s30 }
 0x3d9   : > { %v609_v13 = vpop.xlane.xlu1 %608 }
 0x3da   : > { %v617_v14 = vsub.f32 %v592_v4, %v609_v13 }
 0x3dc   : > { %v620_v15 = vmul.f32 1.442695, %v617_v14 }
 0x3dd   : > { %v649_v16 = vpop.permute.xlu1 %648  ;;  %v612_v17 = vpop.xlane.xlu0 %611 }
 0x3de   : > { %2284 = vpow2.f32 %v620_v15  ;;  %v618_v18 = vsub.f32 %v597_v7, %v612_v17  ;;  %2105 = vmatpush3.msk.msra.mxu0 %vm661_vm6, %v649_v16 }
 0x3df   : > { %2106 = vmatprep.subr.mxu0 %v2340_v22 }
 0x3e0   : > { %v622_v19 = vmul.f32 1.442695, %v618_v18 }
 0x3e1   : > { %v616_v25 = vpop.xlane.xlu0 %615  ;;  %v645_v30 = vpop.permute.xlu1 %644 }
 0x3e2   : > { %2286 = vpow2.f32 %v622_v19  ;;  %v619_v26 = vsub.f32 %v602_v10, %v616_v25 }
 0x3e4   : > { %v624_v27 = vmul.f32 1.442695, %v619_v26 }
 0x3e5   : > { %v847_v31 = vpop.permute.xlu1 %846 }
 0x3e6   : > { %2288 = vpow2.f32 %v624_v27 }
 0x3e9   : > { %v845_v32 = vpop.permute.xlu1 %844 }
 0x3eb   : > { %v2285_v20 = vpop.eup %2284 }
 0x3ec   : > { %v626_v21 = vsel %vm606_vm4, %v2285_v20, 0.0 }
 0x3ed   : > { %627 = vadd.xlane.f32.xlu0 %v626_v21 }
 0x3ef   : > { %v2287_v23 = vpop.eup %2286 }
 0x3f0   : > { %v629_v24 = vsel %vm606_vm4, %v2287_v23, 0.0 }
 0x3f1   : > { %630 = vadd.xlane.f32.xlu1 %v629_v24 }
 0x3f3   : > { %v2289_v28 = vpop.eup %2288 }
 0x3f4   : > { %v632_v29 = vsel %vm613_vm5, %v2289_v28, 0.0 }
 0x402   : > { %836 = vrot.lane.b32.xlu1 %v2487_v62, %s2345_s9 }
 0x403   : > { %646 = vrot.lane.b32.xlu0 %v2472_v53, %s2343_s26 }
 0x406   : > { %840 = vrot.lane.b32.xlu1 %v2502_v3, %s2345_s9 }
 0x422   : > { %633 = vadd.xlane.f32.xlu0 %v632_v29 }
 0x438   : > { %842 = vrot.lane.b32.xlu0 %v2475_v56, %s2344_s30 }
 0x43c   : > { %838 = vrot.lane.b32.xlu0 %v2495_v63, %s2345_s9  ;;  %s2352_s9 = smov 40  }
 0x476   : > { %v628_v33 = vpop.xlane.xlu0 %627 }
 0x477   : > { %2290 = vrcp.f32 %v628_v33 }
 0x47a   : > { %v631_v34 = vpop.xlane.xlu1 %630  ;;  %v647_v35 = vpop.permute.xlu0 %646 }
 0x47b   : > { %2292 = vrcp.f32 %v631_v34  ;;  %2107 = vmatpush3.msra.mxu0 %v647_v35 }
 0x47c   : > { %2108 = vmatprep.subr.mxu0 %v2340_v22 }
 0x47d   : > { %2109 = vmatpush3.msra.mxu0 %v645_v30 }
 0x47e   : > { %2130 = vmatprep.subr.mxu0 %v2340_v22  ;;  %v837_v44 = vpop.permute.xlu1 %836 }
 0x482   : > { %v841_v46 = vpop.permute.xlu1 %840 }
 0x484   : > { %v2291_v36 = vpop.eup %2290 }
 0x485   : > { %v638_v37 = vmul.f32 %v2291_v36, %v2285_v20 }
 0x487   : > { %641 = vst.msk [vmem:[%s2534_s13] sm:$0xff] %vm606_vm4, %v638_v37  ;;  %2111 = vmatmul.mubr.msk.f32.vlgmr.msra.gmra.mxu0 %vm606_vm4, %v638_v37 }
 0x488   : > { %v2293_v38 = vpop.eup %2292  ;;  %2131 = vmatpush3.xpose.msk.msra.mxu0 %vm510_vm3, %v847_v31  ;;  %2113 = vmatprep.mubr.msk.f32.mxu0 %vm2341_vm2, %v2340_v22 }
 0x489   : > { %2132 = vmatprep.subr.mxu0 %v2340_v22  ;;  %v639_v39 = vmul.f32 %v2293_v38, %v2287_v23 }
 0x48b   : > { %642 = vst.msk [vmem:[%s2534_s13 + $0x8] sm:$0xff] %vm606_vm4, %v639_v39  ;;  %2114 = vmatmul.mubr.msk.f32.gmra.mxu0 %vm606_vm4, %v639_v39 }
 0x48c   : > { %2133 = vmatpush3.xpose.msk.msra.mxu0 %vm510_vm3, %v845_v32  ;;  %2116 = vmatprep.mubr.msk.f32.mxu0 %vm2341_vm2, %v2340_v22 }
 0x48d   : > { %2134 = vmatprep.subr.mxu0 %v2340_v22 }
 0x4ab   : > { %v634_v40 = vpop.xlane.xlu0 %633 }
 0x4ac   : > { %2294 = vrcp.f32 %v634_v40 }
 0x4af   : > { %v843_v41 = vpop.permute.xlu0 %842 }
 0x4b0   : > { %2135 = vmatpush3.xpose.msk.msra.mxu0 %vm510_vm3, %v843_v41 }
 0x4b1   : > { %2160 = vmatprep.subr.mxu0 %v2340_v22 }
 0x4b3   : > { %v839_v45 = vpop.permute.xlu0 %838 }
 0x4b9   : > { %v2295_v42 = vpop.eup %2294 }
 0x4ba   : > { %v640_v43 = vmul.f32 %v2295_v42, %v2289_v28 }
 0x4bc   : > { %643 = vst.msk [vmem:[%s2534_s13 + $0x10] sm:$0x1] %vm613_vm5, %v640_v43  ;;  %2117 = vmatmul.mubr.msk.f32.gmra.mxu0 %vm606_vm4, %v640_v43 }
 0x4bd   : > { %2136 = vmatprep.mubr.msk.f32.mxu0 %vm2341_vm2, %v2340_v22 }
 0x4c0   : > { %2137 = vmatmul.mubr.msk.f32.vlgmr.msra.gmra.mxu0 %vm510_vm3, %v837_v44 }
 0x4c1   : > { %2139 = vmatprep.mubr.msk.f32.mxu0 %vm2341_vm2, %v2340_v22 }
 0x4c4   : > { %2140 = vmatmul.mubr.msk.f32.gmra.mxu0 %vm510_vm3, %v839_v45 }
 0x4c5   : > { %2142 = vmatprep.mubr.msk.f32.mxu0 %vm2341_vm2, %v2340_v22 }
 0x4c8   : > { %2143 = vmatmul.mubr.msk.f32.gmra.mxu0 %vm510_vm3, %v841_v46 }
 0x4c9   : > { %2162 = vmatprep.mubr.msk.f32.mxu0 %vm2341_vm2, %v2340_v22 }
 0x547   : > { %v730_v48 = vpop.f32.mrf.mxu0 }
 0x548   : > { %2122 = vmatmul.mubr.msk.f32.vlgmr.msra.gmra.mxu1 %vm510_vm3, %v730_v48  ;;  %v488_v48 = vld [vmem:[%s2791_s5 + $0x8] sm:$0xff] }
 0x549   : > { %v2112_v49 = vpop.f32.mrf.mxu0  ;;  %2124 = vmatprep.mubr.msk.f32.mxu1 %vm2341_vm2, %v2340_v22  ;;  %2161 = vmatpush3.msra.mxu0 %v488_v48 }
 0x54a   : > { %2186 = vmatprep.subr.mxu0 %v2340_v22 }
 0x54b   : > { %v735_v50 = vpop.f32.mrf.mxu0 }
 0x54c   : > { %2125 = vmatmul.mubr.msk.f32.gmra.mxu1 %vm510_vm3, %v735_v50 }
 0x54d   : > { %v2115_v51 = vpop.f32.mrf.mxu0  ;;  %2127 = vmatprep.mubr.msk.f32.mxu1 %vm2341_vm2, %v2340_v22 }
 0x57c   : > { %v740_v52 = vpop.f32.mrf.mxu0 }
 0x57d   : > { %2128 = vmatmul.mubr.msk.f32.gmra.mxu1 %vm510_vm3, %v740_v52 }
 0x57e   : > { %v2118_v54 = vpop.f32.mrf.mxu0  ;;  %2151 = vmatprep.mubr.msk.f32.mxu1 %vm2341_vm2, %v2340_v22 }
 0x580   : > { %v926_v55 = vpop.f32.mrf.mxu0 }
 0x581   : > { %v940_v58 = vsel %vm606_vm4, %v926_v55, -inf }
 0x582   : > { %941 = vmax.xlane.f32.xlu0 %v940_v58  ;;  %v2138_v59 = vpop.f32.mrf.mxu0 }
 0x584   : > { %v931_v60 = vpop.f32.mrf.mxu0 }
 0x585   : > { %v943_v61 = vsel %vm606_vm4, %v931_v60, -inf }
 0x586   : > { %944 = vmax.xlane.f32.xlu1 %v943_v61  ;;  %v2141_v4 = vpop.f32.mrf.mxu0 }
 0x588   : > { %v936_v5 = vpop.f32.mrf.mxu0 }
 0x589   : > { %v946_v6 = vsel %vm613_vm5, %v936_v5, -inf }
 0x58a   : > { %947 = vmax.xlane.f32.xlu0 %v946_v6  ;;  %v2144_v7 = vpop.f32.mrf.mxu0 }
 0x597   : > { %979 = vrot.lane.b32.xlu1 %v2472_v53, %s2346_s16 }
 0x59b   : > { %977 = vrot.lane.b32.xlu1 %v2475_v56, %s2346_s16 }
 0x59f   : > { %1178 = vrot.lane.b32.xlu1 %v2477_v57, %s2347_s17 }
 0x5a0   : > { %981 = vrot.lane.b32.xlu0 %v2477_v57, %s2346_s16 }
 0x5a3   : > { %1174 = vrot.lane.b32.xlu1 %v2475_v56, %s2347_s17 }
 0x608   : > { %v2589_v8 = vpop.f32.mrf.mxu1 }
 0x60a   : > { %v2123_v9 = vpop.f32.mrf.mxu1 }
 0x60b   : > { %v942_v10 = vpop.xlane.xlu0 %941 }
 0x60c   : > { %v949_v11 = vsub.f32 %v926_v55, %v942_v10  ;;  %v2591_v12 = vpop.f32.mrf.mxu1 }
 0x60e   : > { %v952_v13 = vmul.f32 1.442695, %v949_v11  ;;  %v2126_v14 = vpop.f32.mrf.mxu1 }
 0x60f   : > { %v945_v15 = vpop.xlane.xlu1 %944 }
 0x610   : > { %2296 = vpow2.f32 %v952_v13  ;;  %v950_v16 = vsub.f32 %v931_v60, %v945_v15 }
 0x612   : > { %v954_v17 = vmul.f32 1.442695, %v950_v16 }
 0x613   : > { %v948_v18 = vpop.xlane.xlu0 %947  ;;  %v980_v20 = vpop.permute.xlu1 %979 }
 0x614   : > { %2298 = vpow2.f32 %v954_v17  ;;  %v951_v19 = vsub.f32 %v936_v5, %v948_v18 }
 0x616   : > { %v956_v21 = vmul.f32 1.442695, %v951_v19 }
 0x617   : > { %v982_v23 = vpop.permute.xlu0 %981  ;;  %v978_v24 = vpop.permute.xlu1 %977 }
 0x618   : > { %2300 = vpow2.f32 %v956_v21  ;;  %2146 = vmatpush3.msk.msra.mxu1 %vm661_vm6, %v982_v23  ;;  %v1937_v23 = vld [vmem:[%s2792_s6] ss:$0 sm:$0xff] }
 0x619   : > { %2147 = vmatprep.subr.mxu1 %v2340_v22 }
 0x61a   : > { %2148 = vmatpush3.msra.mxu1 %v980_v20 }
 0x61b   : > { %2149 = vmatprep.subr.mxu1 %v2340_v22  ;;  %v1179_v33 = vpop.permute.xlu1 %1178 }
 0x61c   : > { %2150 = vmatpush3.msra.mxu1 %v978_v24  ;;  %v498_v24 = vadd.f32 %v1937_v23, %v2414_v0 }
 0x61d   : > { %v2297_v25 = vpop.eup %2296  ;;  %2171 = vmatprep.subr.mxu1 %v2340_v22 }
 0x61e   : > { %v958_v26 = vsel %vm606_vm4, %v2297_v25, 0.0 }
 0x61f   : > { %959 = vadd.xlane.f32.xlu0 %v958_v26  ;;  %v1175_v35 = vpop.permute.xlu1 %1174  ;;  %v499_v26 = vadd.f32 %v1937_v23, %v2418_v2 }
 0x621   : > { %v2299_v27 = vpop.eup %2298 }
 0x622   : > { %v961_v28 = vsel %vm606_vm4, %v2299_v27, 0.0 }
 0x623   : > { %962 = vadd.xlane.f32.xlu0 %v961_v28 }
 0x625   : > { %v2301_v29 = vpop.eup %2300 }
 0x626   : > { %v964_v30 = vsel %vm613_vm5, %v2301_v29, 0.0 }
 0x627   : > { %965 = vadd.xlane.f32.xlu1 %v964_v30  ;;  %v834_v30 = vadd.f32 %v2591_v12, %v499_v26 }
 0x638   : > { %1170 = vrot.lane.b32.xlu1 %v2495_v63, %s2348_s18 }
 0x639   : > { %1176 = vrot.lane.b32.xlu0 %v2472_v53, %s2347_s17 }
 0x63d   : > { %v2603_v31 = vpop.f32.mrf.mxu1  ;;  %1168 = vrot.lane.b32.xlu0 %v2487_v62, %s2348_s18 }
 0x63f   : > { %v2129_v32 = vpop.f32.mrf.mxu1 }
 0x640   : > { %v500_v32 = vadd.f32 %v1937_v23, %v2416_v1 }
 0x641   : > { %1172 = vrot.lane.b32.xlu0 %v2502_v3, %s2348_s18 }
 0x6a8   : > { %v960_v34 = vpop.xlane.xlu0 %959 }
 0x6a9   : > { %2302 = vrcp.f32 %v960_v34 }
 0x6ac   : > { %v963_v36 = vpop.xlane.xlu0 %962 }
 0x6ad   : > { %2304 = vrcp.f32 %v963_v36 }
 0x6b0   : > { %v966_v37 = vpop.xlane.xlu1 %965  ;;  %v1177_v42 = vpop.permute.xlu0 %1176 }
 0x6b1   : > { %2306 = vrcp.f32 %v966_v37 }
 0x6b4   : > { %v1169_v45 = vpop.permute.xlu0 %1168  ;;  %v1171_v46 = vpop.permute.xlu1 %1170 }
 0x6b6   : > { %v2303_v38 = vpop.eup %2302 }
 0x6b7   : > { %v970_v39 = vmul.f32 %v2303_v38, %v2297_v25  ;;  %v833_v25 = vadd.f32 %v2589_v8, %v498_v24 }
 0x6b8   : > { %v1173_v47 = vpop.permute.xlu0 %1172 }
 0x6b9   : > { %1957 = vst.msk [vmem:[%s2534_s13 + $0x18] sm:$0xff] %vm606_vm4, %v970_v39  ;;  %2152 = vmatmul.mubr.msk.f32.vlgmr.msra.gmra.mxu1 %vm606_vm4, %v970_v39 }
 0x6ba   : > { %v2305_v40 = vpop.eup %2304  ;;  %2172 = vmatpush3.xpose.msk.msra.mxu1 %vm510_vm3, %v1179_v33  ;;  %2154 = vmatprep.mubr.msk.f32.mxu1 %vm2341_vm2, %v2340_v22 }
 0x6bb   : > { %2173 = vmatprep.subr.mxu1 %v2340_v22  ;;  %v971_v41 = vmul.f32 %v2305_v40, %v2299_v27 }
 0x6bd   : > { %1958 = vst.msk [vmem:[%s2534_s13 + $0x20] sm:$0xff] %vm606_vm4, %v971_v41  ;;  %2155 = vmatmul.mubr.msk.f32.gmra.mxu1 %vm606_vm4, %v971_v41 }
 0x6be   : > { %v2307_v43 = vpop.eup %2306  ;;  %2174 = vmatpush3.xpose.msk.msra.mxu1 %vm510_vm3, %v1177_v42  ;;  %2157 = vmatprep.mubr.msk.f32.mxu1 %vm2341_vm2, %v2340_v22 }
 0x6bf   : > { %2175 = vmatprep.subr.mxu1 %v2340_v22  ;;  %v972_v44 = vmul.f32 %v2307_v43, %v2301_v29 }
 0x6c1   : > { %1959 = vst.msk [vmem:[%s2534_s13 + $0x28] sm:$0x1] %vm613_vm5, %v972_v44  ;;  %2158 = vmatmul.mubr.msk.f32.gmra.mxu1 %vm606_vm4, %v972_v44 }
 0x6c2   : > { %2176 = vmatpush3.xpose.msk.msra.mxu1 %vm510_vm3, %v1175_v35  ;;  %2177 = vmatprep.mubr.msk.f32.mxu1 %vm2341_vm2, %v2340_v22 }
 0x6c3   : > { %2201 = vmatprep.subr.mxu1 %v2340_v22 }
 0x6c5   : > { %2178 = vmatmul.mubr.msk.f32.vlgmr.msra.gmra.mxu1 %vm510_vm3, %v1169_v45 }
 0x6c6   : > { %2180 = vmatprep.mubr.msk.f32.mxu1 %vm2341_vm2, %v2340_v22 }
 0x6c9   : > { %2181 = vmatmul.mubr.msk.f32.gmra.mxu1 %vm510_vm3, %v1171_v46 }
 0x6ca   : > { %2183 = vmatprep.mubr.msk.f32.mxu1 %vm2341_vm2, %v2340_v22 }
 0x6cd   : > { %2184 = vmatmul.mubr.msk.f32.gmra.mxu1 %vm510_vm3, %v1173_v47 }
 0x6ce   : > { %2203 = vmatprep.mubr.msk.f32.mxu1 %vm2341_vm2, %v2340_v22 }
 0x779   : > { %v1062_v49 = vpop.f32.mrf.mxu1 }
 0x77a   : > { %2163 = vmatmul.mubr.msk.f32.vlgmr.msra.gmra.mxu0 %vm510_vm3, %v1062_v49 }
 0x77b   : > { %v2153_v50 = vpop.f32.mrf.mxu1  ;;  %2165 = vmatprep.mubr.msk.f32.mxu0 %vm2341_vm2, %v2340_v22 }
 0x77d   : > { %v1067_v51 = vpop.f32.mrf.mxu1 }
 0x77e   : > { %2166 = vmatmul.mubr.msk.f32.gmra.mxu0 %vm510_vm3, %v1067_v51 }
 0x77f   : > { %v2156_v52 = vpop.f32.mrf.mxu1  ;;  %2168 = vmatprep.mubr.msk.f32.mxu0 %vm2341_vm2, %v2340_v22 }
 0x781   : > { %v1072_v54 = vpop.f32.mrf.mxu1 }
 0x782   : > { %2169 = vmatmul.mubr.msk.f32.gmra.mxu0 %vm510_vm3, %v1072_v54  ;;  %v489_v54 = vld [vmem:[%s2791_s5 + $0x10] sm:$0xff] }
 0x783   : > { %v2159_v55 = vpop.f32.mrf.mxu1  ;;  %2192 = vmatprep.mubr.msk.f32.mxu0 %vm2341_vm2, %v2340_v22  ;;  %2202 = vmatpush3.msra.mxu1 %v489_v54 }
 0x784   : > { %2227 = vmatprep.subr.mxu1 %v2340_v22 }
 0x785   : > { %v1258_v58 = vpop.f32.mrf.mxu1 }
 0x786   : > { %v1272_v59 = vsel %vm606_vm4, %v1258_v58, -inf }
 0x787   : > { %1273 = vmax.xlane.f32.xlu1 %v1272_v59  ;;  %v2179_v60 = vpop.f32.mrf.mxu1 }
 0x789   : > { %v1263_v61 = vpop.f32.mrf.mxu1 }
 0x78a   : > { %v1275_v4 = vsel %vm606_vm4, %v1263_v61, -inf }
 0x78b   : > { %1276 = vmax.xlane.f32.xlu0 %v1275_v4  ;;  %v2182_v5 = vpop.f32.mrf.mxu1 }
 0x78d   : > { %v1268_v6 = vpop.f32.mrf.mxu1 }
 0x78e   : > { %v1278_v7 = vsel %vm613_vm5, %v1268_v6, -inf }
 0x78f   : > { %1279 = vmax.xlane.f32.xlu0 %v1278_v7  ;;  %v2185_v9 = vpop.f32.mrf.mxu1 }
 0x798   : > { %1313 = vrot.lane.b32.xlu1 %v2477_v57, %s2349_s21 }
 0x79c   : > { %1309 = vrot.lane.b32.xlu1 %v2475_v56, %s2349_s21 }
 0x7a0   : > { %1510 = vrot.lane.b32.xlu1 %v2477_v57, %s2350_s22 }
 0x7a4   : > { %1508 = vrot.lane.b32.xlu1 %v2472_v53, %s2350_s22 }
 0x810   : > { %v1274_v10 = vpop.xlane.xlu1 %1273 }
 0x811   : > { %v1281_v11 = vsub.f32 %v1258_v58, %v1274_v10 }
 0x813   : > { %v1284_v13 = vmul.f32 1.442695, %v1281_v11 }
 0x814   : > { %v1314_v14 = vpop.permute.xlu1 %1313  ;;  %v1277_v15 = vpop.xlane.xlu0 %1276 }
 0x815   : > { %2308 = vpow2.f32 %v1284_v13  ;;  %v1282_v16 = vsub.f32 %v1263_v61, %v1277_v15  ;;  %2187 = vmatpush3.msk.msra.mxu0 %vm661_vm6, %v1314_v14 }
 0x816   : > { %2188 = vmatprep.subr.mxu0 %v2340_v22 }
 0x817   : > { %v1286_v17 = vmul.f32 1.442695, %v1282_v16 }
 0x818   : > { %v1280_v33 = vpop.xlane.xlu0 %1279  ;;  %v1310_v1 = vpop.permute.xlu1 %1309 }
 0x819   : > { %2310 = vpow2.f32 %v1286_v17  ;;  %v1283_v2 = vsub.f32 %v1268_v6, %v1280_v33 }
 0x81b   : > { %v1288_v37 = vmul.f32 1.442695, %v1283_v2 }
 0x81d   : > { %2312 = vpow2.f32 %v1288_v37 }
 0x822   : > { %v2309_v18 = vpop.eup %2308 }
 0x823   : > { %v1290_v19 = vsel %vm606_vm4, %v2309_v18, 0.0 }
 0x824   : > { %1291 = vadd.xlane.f32.xlu0 %v1290_v19 }
 0x826   : > { %v2311_v20 = vpop.eup %2310 }
 0x827   : > { %v1293_v21 = vsel %vm606_vm4, %v2311_v20, 0.0 }
 0x828   : > { %1294 = vadd.xlane.f32.xlu1 %v1293_v21 }
 0x82a   : > { %v2313_v39 = vpop.eup %2312 }
 0x82b   : > { %v1296_v12 = vsel %vm613_vm5, %v2313_v39, 0.0 }
 0x839   : > { %1500 = vrot.lane.b32.xlu1 %v2487_v62, %s2351_s25  ;;  %v835_v62 = vadd.f32 %v2603_v31, %v500_v32 }
 0x83a   : > { %1311 = vrot.lane.b32.xlu0 %v2472_v53, %s2349_s21  ;;  %v1151_v27 = vpop.f32.mrf.mxu0 }
 0x83b   : > { %v2671_v28 = vadd.f32 %v1151_v27, %v833_v25 }
 0x83c   : > { %v2164_v29 = vpop.f32.mrf.mxu0 }
 0x83d   : > { %1504 = vrot.lane.b32.xlu1 %v2502_v3, %s2351_s25  ;;  %v1511_v3 = vpop.permute.xlu1 %1510 }
 0x83e   : > { %v1156_v0 = vpop.f32.mrf.mxu0 }
 0x83f   : > { %v2676_v8 = vadd.f32 %v1156_v0, %v834_v30 }
 0x840   : > { %v2167_v34 = vpop.f32.mrf.mxu0 }
 0x841   : > { %v1509_v40 = vpop.permute.xlu1 %1508 }
 0x842   : > { %v1161_v35 = vpop.f32.mrf.mxu0 }
 0x843   : > { %v2679_v36 = vadd.f32 %v1161_v35, %v835_v62 }
 0x844   : > { %v2170_v38 = vpop.f32.mrf.mxu0 }
 0x845   : > { %v490_v38 = vld [vmem:[%s2791_s5 + $0x18] sm:$0xff] }
 0x859   : > { %1297 = vadd.xlane.f32.xlu0 %v1296_v12 }
 0x86f   : > { %1506 = vrot.lane.b32.xlu0 %v2475_v56, %s2350_s22 }
 0x873   : > { %1502 = vrot.lane.b32.xlu0 %v2495_v63, %s2351_s25 }
 0x8ad   : > { %v1292_v31 = vpop.xlane.xlu0 %1291 }
 0x8ae   : > { %2314 = vrcp.f32 %v1292_v31 }
 0x8b1   : > { %v1295_v41 = vpop.xlane.xlu1 %1294  ;;  %v1312_v42 = vpop.permute.xlu0 %1311 }
 0x8b2   : > { %2316 = vrcp.f32 %v1295_v41  ;;  %2189 = vmatpush3.msra.mxu0 %v1312_v42 }
 0x8b3   : > { %2190 = vmatprep.subr.mxu0 %v2340_v22 }
 0x8b4   : > { %2191 = vmatpush3.msra.mxu0 %v1310_v1 }
 0x8b5   : > { %2212 = vmatprep.subr.mxu0 %v2340_v22  ;;  %v1501_v50 = vpop.permute.xlu1 %1500 }
 0x8b9   : > { %v1505_v52 = vpop.permute.xlu1 %1504 }
 0x8bb   : > { %v2315_v43 = vpop.eup %2314 }
 0x8bc   : > { %v1302_v44 = vmul.f32 %v2315_v43, %v2309_v18 }
 0x8be   : > { %1973 = vst.msk [vmem:[%s2534_s13 + $0x30] sm:$0xff] %vm606_vm4, %v1302_v44  ;;  %2193 = vmatmul.mubr.msk.f32.vlgmr.msra.gmra.mxu0 %vm606_vm4, %v1302_v44 }
 0x8bf   : > { %v2317_v63 = vpop.eup %2316  ;;  %2213 = vmatpush3.xpose.msk.msra.mxu0 %vm510_vm3, %v1511_v3  ;;  %2195 = vmatprep.mubr.msk.f32.mxu0 %vm2341_vm2, %v2340_v22 }
 0x8c0   : > { %2214 = vmatprep.subr.mxu0 %v2340_v22  ;;  %v1303_v45 = vmul.f32 %v2317_v63, %v2311_v20 }
 0x8c2   : > { %1974 = vst.msk [vmem:[%s2534_s13 + $0x38] sm:$0xff] %vm606_vm4, %v1303_v45  ;;  %2196 = vmatmul.mubr.msk.f32.gmra.mxu0 %vm606_vm4, %v1303_v45 }
 0x8c3   : > { %2215 = vmatpush3.xpose.msk.msra.mxu0 %vm510_vm3, %v1509_v40  ;;  %2198 = vmatprep.mubr.msk.f32.mxu0 %vm2341_vm2, %v2340_v22 }
 0x8c4   : > { %2216 = vmatprep.subr.mxu0 %v2340_v22 }
 0x8e2   : > { %v1298_v46 = vpop.xlane.xlu0 %1297 }
 0x8e3   : > { %2318 = vrcp.f32 %v1298_v46 }
 0x8e6   : > { %v1507_v47 = vpop.permute.xlu0 %1506 }
 0x8e7   : > { %2217 = vmatpush3.xpose.msk.msra.mxu0 %vm510_vm3, %v1507_v47 }
 0x8e8   : > { %2242 = vmatprep.subr.mxu0 %v2340_v22 }
 0x8ea   : > { %v1503_v51 = vpop.permute.xlu0 %1502 }
 0x8f0   : > { %v2319_v48 = vpop.eup %2318 }
 0x8f1   : > { %v1304_v49 = vmul.f32 %v2319_v48, %v2313_v39 }
 0x8f3   : > { %1975 = vst.msk [vmem:[%s2534_s13 + $0x40] sm:$0x1] %vm613_vm5, %v1304_v49  ;;  %2199 = vmatmul.mubr.msk.f32.gmra.mxu0 %vm606_vm4, %v1304_v49 }
 0x8f4   : > { %2218 = vmatprep.mubr.msk.f32.mxu0 %vm2341_vm2, %v2340_v22 }
 0x8f7   : > { %2219 = vmatmul.mubr.msk.f32.vlgmr.msra.gmra.mxu0 %vm510_vm3, %v1501_v50 }
 0x8f8   : > { %2221 = vmatprep.mubr.msk.f32.mxu0 %vm2341_vm2, %v2340_v22  ;;  %2243 = vmatpush3.msra.mxu0 %v490_v38 }
 0x8fb   : > { %2222 = vmatmul.mubr.msk.f32.gmra.mxu0 %vm510_vm3, %v1503_v51 }
 0x8fc   : > { %2224 = vmatprep.mubr.msk.f32.mxu0 %vm2341_vm2, %v2340_v22 }
 0x8ff   : > { %2225 = vmatmul.mubr.msk.f32.gmra.mxu0 %vm510_vm3, %v1505_v52 }
 0x900   : > { %2244 = vmatprep.mubr.msk.f32.mxu0 %vm2341_vm2, %v2340_v22 }
 0x97e   : > { %v1394_v55 = vpop.f32.mrf.mxu0 }
 0x97f   : > { %2204 = vmatmul.mubr.msk.f32.vlgmr.msra.gmra.mxu1 %vm510_vm3, %v1394_v55 }
 0x980   : > { %v2194_v58 = vpop.f32.mrf.mxu0  ;;  %2206 = vmatprep.mubr.msk.f32.mxu1 %vm2341_vm2, %v2340_v22 }
 0x982   : > { %v1399_v59 = vpop.f32.mrf.mxu0 }
 0x983   : > { %2207 = vmatmul.mubr.msk.f32.gmra.mxu1 %vm510_vm3, %v1399_v59 }
 0x984   : > { %v2197_v60 = vpop.f32.mrf.mxu0  ;;  %2209 = vmatprep.mubr.msk.f32.mxu1 %vm2341_vm2, %v2340_v22 }
 0x9b3   : > { %v1404_v61 = vpop.f32.mrf.mxu0 }
 0x9b4   : > { %2210 = vmatmul.mubr.msk.f32.gmra.mxu1 %vm510_vm3, %v1404_v61 }
 0x9b5   : > { %v2200_v4 = vpop.f32.mrf.mxu0  ;;  %2233 = vmatprep.mubr.msk.f32.mxu1 %vm2341_vm2, %v2340_v22 }
 0x9b7   : > { %v1590_v5 = vpop.f32.mrf.mxu0 }
 0x9b8   : > { %v1604_v6 = vsel %vm606_vm4, %v1590_v5, -inf }
 0x9b9   : > { %1605 = vmax.xlane.f32.xlu0 %v1604_v6  ;;  %v2220_v7 = vpop.f32.mrf.mxu0 }
 0x9bb   : > { %v1595_v9 = vpop.f32.mrf.mxu0 }
 0x9bc   : > { %v1607_v10 = vsel %vm606_vm4, %v1595_v9, -inf }
 0x9bd   : > { %1608 = vmax.xlane.f32.xlu1 %v1607_v10  ;;  %v2223_v11 = vpop.f32.mrf.mxu0 }
 0x9bf   : > { %v1600_v13 = vpop.f32.mrf.mxu0 }
 0x9c0   : > { %v1610_v14 = vsel %vm613_vm5, %v1600_v13, -inf }
 0x9c1   : > { %1611 = vmax.xlane.f32.xlu0 %v1610_v14  ;;  %v2226_v15 = vpop.f32.mrf.mxu0 }
 0x9ce   : > { %1643 = vrot.lane.b32.xlu1 %v2472_v53, %s2352_s9 }
 0xa3f   : > { %v1483_v16 = vpop.f32.mrf.mxu1 }
 0xa40   : > { %v2735_v17 = vadd.f32 %v1483_v16, %v2671_v28 }
 0xa41   : > { %v2205_v18 = vpop.f32.mrf.mxu1 }
 0xa42   : > { %v1606_v19 = vpop.xlane.xlu0 %1605 }
 0xa43   : > { %v1613_v20 = vsub.f32 %v1590_v5, %v1606_v19  ;;  %v1488_v21 = vpop.f32.mrf.mxu1 }
 0xa44   : > { %v2738_v23 = vadd.f32 %v1488_v21, %v2676_v8 }
 0xa45   : > { %v1616_v24 = vmul.f32 1.442695, %v1613_v20  ;;  %v2208_v25 = vpop.f32.mrf.mxu1 }
 0xa46   : > { %v1609_v26 = vpop.xlane.xlu1 %1608 }
 0xa47   : > { %2320 = vpow2.f32 %v1616_v24  ;;  %v1614_v27 = vsub.f32 %v1595_v9, %v1609_v26 }
 0xa49   : > { %v1618_v29 = vmul.f32 1.442695, %v1614_v27 }
 0xa4a   : > { %v1612_v30 = vpop.xlane.xlu0 %1611  ;;  %v1644_v12 = vpop.permute.xlu1 %1643 }
 0xa4b   : > { %2322 = vpow2.f32 %v1618_v29  ;;  %v1615_v53 = vsub.f32 %v1600_v13, %v1612_v30 }
 0xa4d   : > { %v1620_v32 = vmul.f32 1.442695, %v1615_v53 }
 0xa4f   : > { %2324 = vpow2.f32 %v1620_v32 }
 0xa54   : > { %v2321_v28 = vpop.eup %2320 }
 0xa55   : > { %v1622_v33 = vsel %vm606_vm4, %v2321_v28, 0.0 }
 0xa56   : > { %1623 = vadd.xlane.f32.xlu0 %v1622_v33 }
 0xa58   : > { %v2323_v0 = vpop.eup %2322 }
 0xa59   : > { %v1625_v2 = vsel %vm606_vm4, %v2323_v0, 0.0 }
 0xa5a   : > { %1626 = vadd.xlane.f32.xlu0 %v1625_v2 }
 0xa5c   : > { %v2325_v8 = vpop.eup %2324 }
 0xa5d   : > { %v1628_v34 = vsel %vm613_vm5, %v2325_v8, 0.0 }
 0xa5e   : > { %1629 = vadd.xlane.f32.xlu1 %v1628_v34 }
 0xa6f   : > { %1641 = vrot.lane.b32.xlu1 %v2475_v56, %s2352_s9 }
 0xa70   : > { %1645 = vrot.lane.b32.xlu0 %v2477_v57, %s2352_s9 }
 0xa74   : > { %v1493_v62 = vpop.f32.mrf.mxu1 }
 0xa75   : > { %v1499_v35 = vadd.f32 %v1493_v62, %v2679_v36 }
 0xa76   : > { %v2211_v37 = vpop.f32.mrf.mxu1 }
 0xadf   : > { %v1624_v39 = vpop.xlane.xlu0 %1623 }
 0xae0   : > { %2326 = vrcp.f32 %v1624_v39 }
 0xae3   : > { %v1627_v1 = vpop.xlane.xlu0 %1626 }
 0xae4   : > { %2328 = vrcp.f32 %v1627_v1 }
 0xae7   : > { %v1630_v3 = vpop.xlane.xlu1 %1629  ;;  %v1646_v40 = vpop.permute.xlu0 %1645 }
 0xae8   : > { %2330 = vrcp.f32 %v1630_v3  ;;  %2228 = vmatpush3.msk.msra.mxu1 %vm661_vm6, %v1646_v40 }
 0xae9   : > { %2229 = vmatprep.subr.mxu1 %v2340_v22 }
 0xaea   : > { %2230 = vmatpush3.msra.mxu1 %v1644_v12 }
 0xaeb   : > { %v1642_v56 = vpop.permute.xlu1 %1641  ;;  %2231 = vmatprep.subr.mxu1 %v2340_v22 }
 0xaec   : > { %2232 = vmatpush3.msra.mxu1 %v1642_v56 }
 0xaed   : > { %v2327_v57 = vpop.eup %2326  ;;  %2253 = vmatprep.subr.mxu1 %v2340_v22 }
 0xaee   : > { %v1634_v36 = vmul.f32 %v2327_v57, %v2321_v28 }
 0xaf0   : > { %1989 = vst.msk [vmem:[%s2534_s13 + $0x48] sm:$0xff] %vm606_vm4, %v1634_v36  ;;  %2234 = vmatmul.mubr.msk.f32.vlgmr.msra.gmra.mxu1 %vm606_vm4, %v1634_v36 }
 0xaf1   : > { %v2329_v31 = vpop.eup %2328  ;;  %2236 = vmatprep.mubr.msk.f32.mxu1 %vm2341_vm2, %v2340_v22  ;;  %2254 = vmatpush3.msra.mxu1 %v490_v38 }
 0xaf2   : > { %v1635_v41 = vmul.f32 %v2329_v31, %v2323_v0 }
 0xaf4   : > { %1990 = vst.msk [vmem:[%s2534_s13 + $0x50] sm:$0xff] %vm606_vm4, %v1635_v41  ;;  %2237 = vmatmul.mubr.msk.f32.gmra.mxu1 %vm606_vm4, %v1635_v41 }
 0xaf5   : > { %v2331_v42 = vpop.eup %2330  ;;  %2239 = vmatprep.mubr.msk.f32.mxu1 %vm2341_vm2, %v2340_v22 }
 0xaf6   : > { %v1636_v43 = vmul.f32 %v2331_v42, %v2325_v8 }
 0xaf8   : > { %1991 = vst.msk [vmem:[%s2534_s13 + $0x58] sm:$0x1] %vm613_vm5, %v1636_v43  ;;  %2240 = vmatmul.mubr.msk.f32.gmra.mxu1 %vm606_vm4, %v1636_v43 }
 0xaf9   : > { %2250 = vmatprep.mubr.msk.f32.mxu1 %vm2341_vm2, %v2340_v22 }
 0xbb0   : > { %v1726_v44 = vpop.f32.mrf.mxu1 }
 0xbb1   : > { %2245 = vmatmul.mubr.msk.f32.vlgmr.msra.gmra.mxu0 %vm510_vm3, %v1726_v44 }
 0xbb2   : > { %v2235_v63 = vpop.f32.mrf.mxu1  ;;  %2247 = vmatprep.mubr.msk.f32.mxu0 %vm2341_vm2, %v2340_v22 }
 0xbb4   : > { %v1731_v45 = vpop.f32.mrf.mxu1 }
 0xbb5   : > { %2248 = vmatmul.mubr.msk.f32.gmra.mxu0 %vm510_vm3, %v1731_v45 }
 0xbb6   : > { %v2238_v46 = vpop.f32.mrf.mxu1 }
 0xbb8   : > { %v1736_v47 = vpop.f32.mrf.mxu1 }
 0xbb9   : > { %2251 = vmatmul.mubr.msk.f32.vlgmr.msra.gmra.mxu1 %vm510_vm3, %v1736_v47 }
 0xbba   : > { %v2241_v48 = vpop.f32.mrf.mxu1 }
 0xc71   : > { %v1815_v49 = vpop.f32.mrf.mxu0 }
 0xc72   : > { %v1829_v50 = vadd.f32 %v1815_v49, %v2735_v17 }
 0xc73   : > { %v2246_v51 = vpop.f32.mrf.mxu0 }
 0xc74   : > { %1832 = vst.msk [vmem:[%s313_s14] sm:$0xff] %vm322_vm0, %v1829_v50 }
 0xc75   : > { %v1820_v22 = vpop.f32.mrf.mxu0 }
 0xc76   : > { %v1830_v52 = vadd.f32 %v1820_v22, %v2738_v23 }
 0xc77   : > { %v2249_v54 = vpop.f32.mrf.mxu0 }
 0xc78   : > { %1833 = vst.msk [vmem:[%s313_s14 + $0x8] sm:$0xff] %vm322_vm0, %v1830_v52 }
 0xc79   : > { %v1825_v55 = vpop.f32.mrf.mxu1 }
 0xc7a   : > { %v1831_v58 = vadd.f32 %v1825_v55, %v1499_v35 }
 0xc7b   : > { %v2252_v59 = vpop.f32.mrf.mxu1 }
 0xc7c   : > { %1834 = vst.msk [vmem:[%s313_s14 + $0x10] sm:$0x1] %vm329_vm1, %v1831_v58 }
 0xc7d PF: > { %s19_s27 = sadd.s32 1, %s2338_s27  }
 0xc7e   : > { %p16_p4 = scmp.ge.s32.totalorder %s19_s27, 4  }
 0xc80   :  { %18 = sbr.rel (!%p16_p4) target bundleno = 1 (0x1), region = 93 }

// kernel: vit_forward.7
= control target key start
LH: loop header
LB: loop body
LE: loop exit
PB: predicated region body
PF: predicated region fallthrough
CT: control target
= control target key end

     0   :  { %vm22_vm0 = vcmask 254976   ;;  %s261_s0 = inlined_call_operand.vmem [shape: f32[2,32], index: 0, kind: input, shape index: {}]   ;;  %s262_s1 = inlined_call_operand.vmem [shape: f32[1,32], index: 1, kind: input, shape index: {}]   ;;  %s263_s2 = inlined_call_operand.vmem [shape: f32[1,32], index: 2, kind: input, shape index: {}]   ;;  %s264_s3 = inlined_call_operand.vmem [shape: f32[32,10], index: 3, kind: input, shape index: {}]   ;;  %s265_s4 = inlined_call_operand.vmem [shape: f32[1,10], index: 4, kind: input, shape index: {}]   ;;  %s266_s5 = inlined_call_operand.hbm [shape: f32[2,10], index: 5, kind: output, shape index: {}]  }
   0x1   :  { %v21_v0 = vld [vmem:[%s261_s0] sm:$0x3] }
   0x2   :  { %10 = vsyncpa [#allocation3], 0  ;;  %v23_v1 = vsel %vm22_vm0, %v21_v0, 0.0  ;;  %v56_v7 = vld [vmem:[%s264_s3 + $0x18] sm:$0xff]  ;;  %v201_v8 = vmov 0.0   ;;  %v55_v9 = vld [vmem:[%s264_s3 + $0x10] sm:$0xff] }
   0x3   :  { %24 = vadd.xlane.f32.xlu0 %v23_v1  ;;  %163 = vmatprep.subr.mxu0 %v201_v8  ;;  %vm202_vm1 = vmmov 0   ;;  %v54_v10 = vld [vmem:[%s264_s3 + $0x8] sm:$0xff]  ;;  %v53_v11 = vld [vmem:[%s264_s3] sm:$0xff]  ;;  %vm64_vm2 = vcmask 261120   ;;  %s203_s7 = smov [#allocation2]   ;;  %vm138_vm3 = vcmask 74752  }
   0x4   :  { %171 = vmatprep.mubr.msk.f32.mxu0 %vm202_vm1, %v201_v8  ;;  %164 = vmatpush3.msra.mxu0 %v56_v7  ;;  %v154_v16 = vld [vmem:[%s262_s1] ss:$0 sm:$0xff]  ;;  %s146_s8 = sshll.u32 %s203_s7, 4  ;;  %s147_s8 = int_to_ptr.vmem [resolvable:$true] %s146_s8 }
   0x5   :  { %165 = vmatprep.subr.mxu0 %v201_v8  ;;  %v155_v18 = vld [vmem:[%s263_s2] ss:$0 sm:$0xff]  ;;  %s179_s1 = scalar_lea.vmem %s147_s8, 32  ;;  %p184_p1 = scmp.lt.s32.totalorder %s147_s8, %s147_s8 }
   0x6   :  { %166 = vmatpush3.msra.mxu0 %v55_v9  ;;  %v156_v21 = vld [vmem:[%s265_s4] ss:$0 sm:$0xff]  ;;  %p180_p0 = scmp.ne.s32.totalorder %s147_s8, %s179_s1  ;;  %p185_p2 = scmp.lt.s32.totalorder %s179_s1, %s179_s1 }
   0x7   :  { %167 = vmatprep.subr.mxu0 %v201_v8 }
   0x8   :  { %168 = vmatpush3.msra.mxu0 %v54_v10  ;;  %p186_p3 = por %p185_p2, %p184_p1 }
   0x9   :  { %169 = vmatprep.subr.mxu0 %v201_v8 }
   0xa   :  { %170 = vmatpush3.msra.mxu0 %v53_v11  ;;  %p187_p4 = pnand %p186_p3, %p180_p0 }
  0x8c   :  { %v25_v2 = vpop.xlane.xlu0 %24 }
  0x8d   :  { %v27_v3 = vmul.f32 0.03125, %v25_v2 }
  0x8f   :  { %v28_v4 = vsub.f32 %v21_v0, %v27_v3 }
  0x91   :  { %v29_v5 = vmul.f32 %v28_v4, %v28_v4 }
  0x93   :  { %v30_v6 = vsel %vm22_vm0, %v29_v5, 0.0 }
  0x94   :  { %31 = vadd.xlane.f32.xlu0 %v30_v6 }
 0x11d   :  { %v32_v12 = vpop.xlane.xlu0 %31 }
 0x11e   :  { %v33_v13 = vmul.f32 0.03125, %v32_v12 }
 0x120   :  { %v34_v14 = vadd.f32 1e-05, %v33_v13 }
 0x122   :  { %177 = vrsqrt.f32 %v34_v14 }
 0x12f   :  { %v178_v15 = vpop.eup %177 }
 0x130   :  { %v36_v17 = vmul.f32 %v178_v15, %v28_v4 }
 0x132   :  { %v44_v19 = vmul.f32 %v154_v16, %v36_v17 }
 0x134   :  { %v52_v20 = vadd.f32 %v155_v18, %v44_v19 }
 0x136   :  { %172 = vmatmul.mubr.msk.f32.vlgmr.msra.gmra.mxu0 %vm64_vm2, %v52_v20 }
 0x1f6   :  { %v134_v22 = vpop.f32.mrf.mxu0 }
 0x1f7   :  { %v135_v23 = vadd.f32 %v156_v21, %v134_v22 }
 0x1f8   :  { %v173_v24 = vpop.f32.mrf.mxu0 }
 0x1f9   :  { %139 = vst.msk [vmem:[#allocation2] sm:$0x3] %vm138_vm3, %v135_v23 }
 0x1fa   :  { %190 = shalt.err (!%p187_p4)
}
 0x1fb   :  { %149 = dma.vmem_to_hbm [thread:$0]  %s147_s8, 32, %s266_s5, [#allocation3]  }
 0x1fc   :  { %199 = dma.done.wait [#allocation3], 32  }
 0x1fd   :  { %200 = vsyncadd [#allocation3], 4294967264 }
 0x1fe   :  { %153 = vsyncpa [#allocation3], 1 }

</bundles_post_ra>
